<compile_context>
chip_gen: v7x
topology: tpu7x:2x2x1
jax: 0.10.0
libtpu: 0.0.40
codegen_flags: <defaults>
</compile_context>

<pallas_src>
import math
import functools

import numpy as np
import jax
import jax.numpy as jnp
from jax import lax
from jax.experimental import pallas as pl
from jax.experimental.pallas import tpu as pltpu


# ----------------------------------------------------------------------------
# host-side helpers (tiny, static, precomputed once)
# ----------------------------------------------------------------------------
def _adaptive_pool_matrix(H, W, k1):
    """MT[h*W+w, i*k1+j] = torch.nn.AdaptiveAvgPool2d averaging weight.

    Every column sums to 1 -- which is exactly what makes the in-kernel
    rewrite pool(Wf@out + bf) == Wf@(out@MT) + bf valid."""
    def axis_mat(size):
        m = np.zeros((k1, size), np.float32)
        for i in range(k1):
            s = (i * size) // k1
            e = -((-(i + 1) * size) // k1)      # ceil((i+1)*size/k1)
            m[i, s:e] = 1.0 / float(e - s)
        return m
    M = np.kron(axis_mat(H), axis_mat(W))       # (k1*k1, H*W)
    return M.T                                  # (H*W, k1*k1)


def _tap_masks(H, W, k1, d1):
    """masks[t, y*W+x] = 1 iff conv tap t = (ki, kj) reads an in-image pixel."""
    masks = np.zeros((k1 * k1, H * W), np.float32)
    yy = np.arange(H)[:, None]
    xx = np.arange(W)[None, :]
    t = 0
    for ki in range(k1):
        dy = ki * d1 - d1
        for kj in range(k1):
            dx = kj * d1 - d1
            ok = ((yy + dy >= 0) & (yy + dy < H) &
                  (xx + dx >= 0) & (xx + dx < W))
            masks[t] = ok.reshape(-1).astype(np.float32)
            t += 1
    return masks


# ----------------------------------------------------------------------------
# the fused kernel
# ----------------------------------------------------------------------------
def dcfm_fused_kernel(x2_ref, x1_ref, wq_ref, wkv_ref, wf3_ref, bfm_ref,
                      mt_ref, mask_ref, bacf_ref, o_ref, vbuf_ref,
                      *, Cq, H, W, k1, d1, s_pad, cd):
    f32 = jnp.float32
    HW = H * W

    # ---- 1x1 convolutions (biases folded into the trailing ones row of x) ---
    q = jnp.dot(wq_ref[...], x2_ref[...], preferred_element_type=f32)    # (Cq, HW)
    kv = jnp.dot(wkv_ref[...], x1_ref[...], preferred_element_type=f32)  # (2Cq, HW)
    k = kv[:Cq, :]
    v = kv[Cq:, :]

    # ---- channel-affinity attention (softmax over the Cq key channels) ------
    aff = lax.dot_general(q.astype(cd), k.astype(cd),
                          (((1,), (1,)), ((), ())),
                          preferred_element_type=f32)                    # (Cq, Cq)
    aff = aff - jnp.max(aff, axis=-1, keepdims=True)
    e = jnp.exp(aff)
    aff = e * pl.reciprocal(jnp.sum(e, axis=-1, keepdims=True), approx=True)

    v_c = v.astype(cd)
    out = jnp.dot(aff.astype(cd), v_c, preferred_element_type=f32) + q   # (Cq, HW)

    # ---- adaptive average pooling hoisted BEFORE filter_conv ----------------
    # pool(Wf @ out + bf) == Wf @ (out @ MT) + bf   (MT columns sum to 1)
    pooled = jnp.dot(out.astype(cd), mt_ref[...],
                     preferred_element_type=f32)                         # (Cq, k1*k1)

    # ---- dynamic dilated conv, fused (v never leaves VMEM) ------------------
    # Zero-padded flat copy of v: reading the interior at lane offset p + s,
    # s = dy*W + dx, is the spatial shift (dy, dx); the host-built masks zero
    # the row-wrap / out-of-image positions.
    vbuf_ref[...] = jnp.zeros_like(vbuf_ref)
    vbuf_ref[:, s_pad:s_pad + HW] = v_c

    masks = mask_ref[...]                    # (k1*k1, HW)  0/1
    bfm = bfm_ref[...]                       # (Cq, Cq)     filter_conv bias, [o, i]
    wf3 = wf3_ref[...]                       # (Cq, Cq, Cq) filter_conv weight, [c, o, i]
    wf_sl = [wf3[c] for c in range(Cq)]      # Cq x (Cq, Cq), hoisted out of loops

    acc = jnp.zeros((Cq, HW), f32)
    for ki in range(k1):
        dy = ki * d1 - d1
        for kj in range(k1):
            dx = kj * d1 - d1
            t = ki * k1 + kj
            # per-tap dynamic weight:
            #   G_t[o, i] = bf[o, i] + sum_c wf[c, o, i] * pooled[c, t]
            g_t = bfm
            for c in range(Cq):
                g_t = g_t + pooled[c:c + 1, t:t + 1] * wf_sl[c]
            s = dy * W + dx
            shifted = vbuf_ref[:, s_pad + s:s_pad + s + HW] * masks[t:t + 1, :]
            acc = acc + jnp.dot(g_t.astype(cd), shifted,
                                preferred_element_type=f32)

    o_ref[...] = acc + bacf_ref[...]         # + AdaptiveConv bias, (Cq, HW) f32


# ----------------------------------------------------------------------------
# wrapper
# ----------------------------------------------------------------------------
def dcfm_forward(feats_encoder, feats_encode, params, k1, d1,
                 compute_dtype=jnp.bfloat16):
    N, C, H, W = feats_encode.shape
    assert N == 1, "DCFMlayer semantics (g_k1.view / AdaptiveConv) require N == 1"
    assert feats_encoder.shape == (N, 2 * C, H, W)
    Cq = C // 2
    HW = H * W
    H_out = H + 2 * d1 - d1 * (k1 - 1)
    W_out = W + 2 * d1 - d1 * (k1 - 1)
    assert (H_out, W_out) == (H, W), \
        "fused dilated-conv path assumes k1 == 3 (same-size conv)"
    # TODO(synk): general k1 (output size != input size) needs an im2col fallback.
    assert 0 < d1 < min(H, W)

    cd = np.dtype(compute_dtype)
    f32 = jnp.float32

    # inputs: flatten to (C, HW) and append a ones row (bias fold)
    ones = jnp.ones((1, HW), f32)
    x2 = jnp.concatenate([feats_encoder.reshape(2 * C, HW).astype(f32), ones],
                         axis=0).astype(cd)                              # (2C+1, HW)
    x1 = jnp.concatenate([feats_encode.reshape(C, HW).astype(f32), ones],
                         axis=0).astype(cd)                              # (C+1, HW)

    # weights: fold biases as an extra column; stack key/value weights
    wq = jnp.concatenate([params["wq"], params["bq"]], axis=1).astype(cd)   # (Cq, 2C+1)
    wkv = jnp.concatenate(
        [jnp.concatenate([params["wk"], params["bk"]], axis=1),
         jnp.concatenate([params["wv"], params["bv"]], axis=1)],
        axis=0).astype(cd)                                                  # (2Cq, C+1)
    # filter_conv weight rearranged to [c, o, i] so per-tap weights are built
    # without any in-kernel reshape/transpose
    wf3 = params["wf"].reshape(Cq, Cq, Cq).transpose(2, 0, 1).astype(f32)   # (Cq, Cq, Cq)
    bfm = params["bf"].reshape(Cq, Cq).astype(f32)                          # (Cq, Cq)
    mt = jnp.asarray(_adaptive_pool_matrix(H, W, k1), dtype=cd)             # (HW, k1*k1)
    masks = jnp.asarray(_tap_masks(H, W, k1, d1), dtype=cd)                 # (k1*k1, HW)
    bacf = params["b_acf"].astype(f32)                                      # (Cq, 1)

    # padded-scratch geometry for the in-kernel spatial shifts
    max_shift = d1 * W + d1
    s_pad = ((max_shift + 127) // 128) * 128     # keep the interior lane-aligned
    HWp = HW + 2 * s_pad

    kern = functools.partial(dcfm_fused_kernel, Cq=Cq, H=H, W=W, k1=k1, d1=d1,
                             s_pad=s_pad, cd=cd)

    args = (x2, x1, wq, wkv, wf3, bfm, mt, masks, bacf)
    in_bytes = sum(int(a.size) * a.dtype.itemsize for a in args)
    out_bytes = Cq * HW * 4
    flops = 2 * HW * (Cq * (2 * C + 1) + 2 * Cq * (C + 1) + 2 * Cq * Cq
                      + Cq * k1 * k1 + k1 * k1 * Cq * Cq)
    vmem_limit = int(min(48 * 2**20,
                         max(4 * 2**20,
                             6 * (in_bytes + out_bytes) + 32 * Cq * HW * 4)))

    dyn = pl.pallas_call(
        kern,
        out_shape=jax.ShapeDtypeStruct((Cq, HW), f32),
        in_specs=[pl.BlockSpec(memory_space=pltpu.MemorySpace.VMEM)] * len(args),
        out_specs=pl.BlockSpec(memory_space=pltpu.MemorySpace.VMEM),
        scratch_shapes=[pltpu.VMEM((Cq, HWp), cd)],
        compiler_params=pltpu.CompilerParams(vmem_limit_bytes=vmem_limit),
        cost_estimate=pl.CostEstimate(flops=flops, transcendentals=Cq * Cq,
                                      bytes_accessed=in_bytes + out_bytes),
    )(*args)

    return dyn.reshape(1, Cq, H_out, W_out)


# ----------------------------------------------------------------------------
# Deterministic parameter init (shapes from DCFMlayer.__init__).
# ----------------------------------------------------------------------------
def init_params(key, channel, k1):
    C = channel
    Cq = C // 2
    ks = jax.random.split(key, 9)

    def u(k, shape, fan_in):
        bound = 1.0 / math.sqrt(fan_in)
        return jax.random.uniform(k, shape, jnp.float32, -bound, bound)

    return dict(
        wq=u(ks[0], (Cq, 2 * C), 2 * C),          bq=u(ks[1], (Cq, 1), 2 * C),
        wk=u(ks[2], (Cq, C), C),                  bk=u(ks[3], (Cq, 1), C),
        wv=u(ks[4], (Cq, C), C),                  bv=u(ks[5], (Cq, 1), C),
        wf=u(ks[6], (Cq * Cq, Cq), Cq),           bf=u(ks[7], (Cq * Cq, 1), Cq),
        b_acf=u(ks[8], (Cq, 1), Cq * k1 * k1),    # AdaptiveConv.reset_parameters
    )


# ----------------------------------------------------------------------------
# Pure-JAX reference (for in-script verification only).
# ----------------------------------------------------------------------------
def dcfm_reference(feats_encoder, feats_encode, params, k1, d1):
    N, C, H, W = feats_encode.shape
    Cq = C // 2
    hp = jax.lax.Precision.HIGHEST

    def conv1x1(x, w, b):
        return jnp.einsum("oc,nchw->nohw", w, x, precision=hp) + b.reshape(1, -1, 1, 1)

    q = conv1x1(feats_encoder, params["wq"], params["bq"]).reshape(N, Cq, H * W)
    k = conv1x1(feats_encode, params["wk"], params["bk"]).reshape(N, Cq, H * W).transpose(0, 2, 1)
    v = conv1x1(feats_encode, params["wv"], params["bv"]).reshape(N, Cq, H * W)
    aff = jax.nn.softmax(jnp.matmul(q, k, precision=hp), axis=-1)
    out = jnp.matmul(aff, v, precision=hp) + q
    out = out.reshape(N, Cq, H, W)
    filt = conv1x1(out, params["wf"], params["bf"])          # (N, Cq^2, H, W)

    def bounds(i, size):
        return (i * size) // k1, -((-(i + 1) * size) // k1)

    rows = []
    for i in range(k1):
        hs, he = bounds(i, H)
        cols = []
        for j in range(k1):
            ws, we = bounds(j, W)
            cols.append(filt[:, :, hs:he, ws:we].mean(axis=(2, 3)))
        rows.append(jnp.stack(cols, axis=-1))
    g = jnp.stack(rows, axis=-2).reshape(Cq, Cq, k1, k1)

    f = v.reshape(N, Cq, H, W)
    dyn = lax.conv_general_dilated(
        f, g, window_strides=(1, 1), padding=[(d1, d1), (d1, d1)],
        rhs_dilation=(d1, d1), dimension_numbers=("NCHW", "OIHW", "NCHW"),
        precision=hp)
    return dyn + params["b_acf"].reshape(1, -1, 1, 1)


if __name__ == "__main__":
    key = jax.random.PRNGKey(0)
    k1, d1, channel = 3, 1, 8
    N, C, H, W = 1, channel, 16, 16

    k_in, k_par = jax.random.split(key)
    k_enc2, k_enc = jax.random.split(k_in)
    feats_encoder = jax.random.normal(k_enc2, (N, 2 * C, H, W), jnp.float32)
    feats_encode = jax.random.normal(k_enc, (N, C, H, W), jnp.float32)
    params = init_params(k_par, channel, k1)

    ref = dcfm_reference(feats_encoder, feats_encode, params, k1, d1)

    # f32 compute path: tight semantic check against the pure-JAX reference.
    out_f32 = jax.block_until_ready(
        dcfm_forward(feats_encoder, feats_encode, params, k1, d1,
                     compute_dtype=jnp.float32))
    assert out_f32.shape == ref.shape == (1, channel // 2, H, W)
    np.testing.assert_allclose(np.asarray(out_f32), np.asarray(ref),
                               rtol=2e-2, atol=2e-2)

    # bf16 compute path (halves DMA/VMEM for the HW-axis matmul operands,
    # f32 accumulation): looser sanity tolerance.
    out_bf16 = jax.block_until_ready(
        dcfm_forward(feats_encoder, feats_encode, params, k1, d1,
                     compute_dtype=jnp.bfloat16))
    np.testing.assert_allclose(np.asarray(out_bf16), np.asarray(ref),
                               rtol=1e-1, atol=1e-1)

    print("KERNEL_OK")
</pallas_src>

<mosaic_0001>
module attributes {stable_mosaic.version = 11 : i64} {
  func.func @dcfm_fused_kernel(%arg0: memref<17x256xf32, #tpu.memory_space<vmem>>, %arg1: memref<9x256xf32, #tpu.memory_space<vmem>>, %arg2: memref<4x17xf32, #tpu.memory_space<vmem>>, %arg3: memref<8x9xf32, #tpu.memory_space<vmem>>, %arg4: memref<4x4x4xf32, #tpu.memory_space<vmem>>, %arg5: memref<4x4xf32, #tpu.memory_space<vmem>>, %arg6: memref<256x9xf32, #tpu.memory_space<vmem>>, %arg7: memref<9x256xf32, #tpu.memory_space<vmem>>, %arg8: memref<4x1xf32, #tpu.memory_space<vmem>>, %arg9: memref<4x256xf32, #tpu.memory_space<vmem>>, %arg10: memref<4x512xf32, #tpu.memory_space<vmem>>) attributes {dimension_semantics = [], scalar_prefetch = 0 : i64, scratch_operands = 1 : i64, tpu.core_type = #tpu.core_type<tc>} {
    %c0 = arith.constant 0 : index
    %c0_0 = arith.constant 0 : index
    %0 = vector.load %arg2[%c0, %c0_0] : memref<4x17xf32, #tpu.memory_space<vmem>>, vector<4x17xf32>
    %c0_1 = arith.constant 0 : index
    %c0_2 = arith.constant 0 : index
    %1 = vector.load %arg0[%c0_1, %c0_2] : memref<17x256xf32, #tpu.memory_space<vmem>>, vector<17x256xf32>
    %cst = arith.constant dense<0.000000e+00> : vector<4x256xf32>
    %2 = tpu.matmul %0, %1, %cst {dimension_numbers = #tpu.dot_dimension_numbers<[1], [0], [0], [1], [0, 0, 1, 1], [], []>} : vector<4x17xf32>, vector<17x256xf32>, vector<4x256xf32> -> vector<4x256xf32>
    %c0_3 = arith.constant 0 : index
    %c0_4 = arith.constant 0 : index
    %3 = vector.load %arg3[%c0_3, %c0_4] : memref<8x9xf32, #tpu.memory_space<vmem>>, vector<8x9xf32>
    %c0_5 = arith.constant 0 : index
    %c0_6 = arith.constant 0 : index
    %4 = vector.load %arg1[%c0_5, %c0_6] : memref<9x256xf32, #tpu.memory_space<vmem>>, vector<9x256xf32>
    %cst_7 = arith.constant dense<0.000000e+00> : vector<8x256xf32>
    %5 = tpu.matmul %3, %4, %cst_7 {dimension_numbers = #tpu.dot_dimension_numbers<[1], [0], [0], [1], [0, 0, 1, 1], [], []>} : vector<8x9xf32>, vector<9x256xf32>, vector<8x256xf32> -> vector<8x256xf32>
    %6 = vector.extract_strided_slice %5 {offsets = [0, 0], sizes = [4, 256], strides = [1, 1]} : vector<8x256xf32> to vector<4x256xf32>
    %7 = vector.extract_strided_slice %5 {offsets = [4, 0], sizes = [4, 256], strides = [1, 1]} : vector<8x256xf32> to vector<4x256xf32>
    %cst_8 = arith.constant dense<0.000000e+00> : vector<4x4xf32>
    %8 = tpu.matmul %2, %6, %cst_8 {dimension_numbers = #tpu.dot_dimension_numbers<[1], [1], [0], [0], [0, 0, 1, 0], [], []>} : vector<4x256xf32>, vector<4x256xf32>, vector<4x4xf32> -> vector<4x4xf32>
    %cst_9 = arith.constant dense<0xFF800000> : vector<4xf32>
    %9 = vector.multi_reduction <maximumf>, %8, %cst_9 [1] : vector<4x4xf32> to vector<4xf32>
    %10 = vector.shape_cast %9 : vector<4xf32> to vector<4x1xf32>
    %11 = vector.broadcast %10 : vector<4x1xf32> to vector<4x4xf32>
    %12 = arith.subf %8, %11 : vector<4x4xf32>
    %13 = math.exp %12 : vector<4x4xf32>
    %cst_10 = arith.constant dense<0.000000e+00> : vector<4xf32>
    %14 = vector.multi_reduction <add>, %13, %cst_10 [1] : vector<4x4xf32> to vector<4xf32>
    %15 = vector.shape_cast %14 : vector<4xf32> to vector<4x1xf32>
    %16 = tpu.reciprocal %15 {approx = true} : vector<4x1xf32> -> vector<4x1xf32>
    %17 = vector.broadcast %16 : vector<4x1xf32> to vector<4x4xf32>
    %18 = arith.mulf %13, %17 : vector<4x4xf32>
    %cst_11 = arith.constant dense<0.000000e+00> : vector<4x256xf32>
    %19 = tpu.matmul %18, %7, %cst_11 {dimension_numbers = #tpu.dot_dimension_numbers<[1], [0], [0], [1], [0, 0, 1, 1], [], []>} : vector<4x4xf32>, vector<4x256xf32>, vector<4x256xf32> -> vector<4x256xf32>
    %20 = arith.addf %19, %2 : vector<4x256xf32>
    %c0_12 = arith.constant 0 : index
    %c0_13 = arith.constant 0 : index
    %21 = vector.load %arg6[%c0_12, %c0_13] : memref<256x9xf32, #tpu.memory_space<vmem>>, vector<256x9xf32>
    %cst_14 = arith.constant dense<0.000000e+00> : vector<4x9xf32>
    %22 = tpu.matmul %20, %21, %cst_14 {dimension_numbers = #tpu.dot_dimension_numbers<[1], [0], [0], [1], [0, 0, 1, 1], [], []>} : vector<4x256xf32>, vector<256x9xf32>, vector<4x9xf32> -> vector<4x9xf32>
    %cst_15 = arith.constant 0.000000e+00 : f32
    %23 = vector.broadcast %cst_15 : f32 to vector<4x512xf32>
    %c0_16 = arith.constant 0 : index
    %c0_17 = arith.constant 0 : index
    %24 = vector.load %arg10[%c0_16, %c0_17] : memref<4x512xf32, #tpu.memory_space<vmem>>, vector<4x512xf32>
    tpu.vector_store %arg10[%c0_16, %c0_17], %23 {strides = array<i32>} : memref<4x512xf32, #tpu.memory_space<vmem>>, vector<4x512xf32>,
    %c0_18 = arith.constant 0 : index
    %c128 = arith.constant 128 : index
    %25 = vector.load %arg10[%c0_18, %c128] : memref<4x512xf32, #tpu.memory_space<vmem>>, vector<4x256xf32>
    tpu.vector_store %arg10[%c0_18, %c128], %7 {strides = array<i32>} : memref<4x512xf32, #tpu.memory_space<vmem>>, vector<4x256xf32>,
    %c0_19 = arith.constant 0 : index
    %c0_20 = arith.constant 0 : index
    %26 = vector.load %arg7[%c0_19, %c0_20] : memref<9x256xf32, #tpu.memory_space<vmem>>, vector<9x256xf32>
    %c0_21 = arith.constant 0 : index
    %c0_22 = arith.constant 0 : index
    %27 = vector.load %arg5[%c0_21, %c0_22] : memref<4x4xf32, #tpu.memory_space<vmem>>, vector<4x4xf32>
    %c0_23 = arith.constant 0 : index
    %c0_24 = arith.constant 0 : index
    %c0_25 = arith.constant 0 : index
    %28 = vector.load %arg4[%c0_23, %c0_24, %c0_25] : memref<4x4x4xf32, #tpu.memory_space<vmem>>, vector<4x4x4xf32>
    %29 = vector.extract_strided_slice %28 {offsets = [0, 0, 0], sizes = [1, 4, 4], strides = [1, 1, 1]} : vector<4x4x4xf32> to vector<1x4x4xf32>
    %30 = vector.shape_cast %29 : vector<1x4x4xf32> to vector<4x4xf32>
    %31 = vector.extract_strided_slice %28 {offsets = [1, 0, 0], sizes = [1, 4, 4], strides = [1, 1, 1]} : vector<4x4x4xf32> to vector<1x4x4xf32>
    %32 = vector.shape_cast %31 : vector<1x4x4xf32> to vector<4x4xf32>
    %33 = vector.extract_strided_slice %28 {offsets = [2, 0, 0], sizes = [1, 4, 4], strides = [1, 1, 1]} : vector<4x4x4xf32> to vector<1x4x4xf32>
    %34 = vector.shape_cast %33 : vector<1x4x4xf32> to vector<4x4xf32>
    %35 = vector.extract_strided_slice %28 {offsets = [3, 0, 0], sizes = [1, 4, 4], strides = [1, 1, 1]} : vector<4x4x4xf32> to vector<1x4x4xf32>
    %36 = vector.shape_cast %35 : vector<1x4x4xf32> to vector<4x4xf32>
    %cst_26 = arith.constant 0.000000e+00 : f32
    %37 = vector.broadcast %cst_26 : f32 to vector<4x256xf32>
    %38 = vector.extract_strided_slice %22 {offsets = [0, 0], sizes = [1, 1], strides = [1, 1]} : vector<4x9xf32> to vector<1x1xf32>
    %39 = vector.broadcast %38 : vector<1x1xf32> to vector<4x4xf32>
    %40 = arith.mulf %39, %30 : vector<4x4xf32>
    %41 = arith.addf %27, %40 : vector<4x4xf32>
    %42 = vector.extract_strided_slice %22 {offsets = [1, 0], sizes = [1, 1], strides = [1, 1]} : vector<4x9xf32> to vector<1x1xf32>
    %43 = vector.broadcast %42 : vector<1x1xf32> to vector<4x4xf32>
    %44 = arith.mulf %43, %32 : vector<4x4xf32>
    %45 = arith.addf %41, %44 : vector<4x4xf32>
    %46 = vector.extract_strided_slice %22 {offsets = [2, 0], sizes = [1, 1], strides = [1, 1]} : vector<4x9xf32> to vector<1x1xf32>
    %47 = vector.broadcast %46 : vector<1x1xf32> to vector<4x4xf32>
    %48 = arith.mulf %47, %34 : vector<4x4xf32>
    %49 = arith.addf %45, %48 : vector<4x4xf32>
    %50 = vector.extract_strided_slice %22 {offsets = [3, 0], sizes = [1, 1], strides = [1, 1]} : vector<4x9xf32> to vector<1x1xf32>
    %51 = vector.broadcast %50 : vector<1x1xf32> to vector<4x4xf32>
    %52 = arith.mulf %51, %36 : vector<4x4xf32>
    %53 = arith.addf %49, %52 : vector<4x4xf32>
    %c0_27 = arith.constant 0 : index
    %c111 = arith.constant 111 : index
    %54 = vector.load %arg10[%c0_27, %c111] : memref<4x512xf32, #tpu.memory_space<vmem>>, vector<4x256xf32>
    %55 = vector.extract_strided_slice %26 {offsets = [0, 0], sizes = [1, 256], strides = [1, 1]} : vector<9x256xf32> to vector<1x256xf32>
    %56 = vector.broadcast %55 : vector<1x256xf32> to vector<4x256xf32>
    %57 = arith.mulf %54, %56 : vector<4x256xf32>
    %cst_28 = arith.constant dense<0.000000e+00> : vector<4x256xf32>
    %58 = tpu.matmul %53, %57, %cst_28 {dimension_numbers = #tpu.dot_dimension_numbers<[1], [0], [0], [1], [0, 0, 1, 1], [], []>} : vector<4x4xf32>, vector<4x256xf32>, vector<4x256xf32> -> vector<4x256xf32>
    %59 = arith.addf %37, %58 : vector<4x256xf32>
    %60 = vector.extract_strided_slice %22 {offsets = [0, 1], sizes = [1, 1], strides = [1, 1]} : vector<4x9xf32> to vector<1x1xf32>
    %61 = vector.broadcast %60 : vector<1x1xf32> to vector<4x4xf32>
    %62 = arith.mulf %61, %30 : vector<4x4xf32>
    %63 = arith.addf %27, %62 : vector<4x4xf32>
    %64 = vector.extract_strided_slice %22 {offsets = [1, 1], sizes = [1, 1], strides = [1, 1]} : vector<4x9xf32> to vector<1x1xf32>
    %65 = vector.broadcast %64 : vector<1x1xf32> to vector<4x4xf32>
    %66 = arith.mulf %65, %32 : vector<4x4xf32>
    %67 = arith.addf %63, %66 : vector<4x4xf32>
    %68 = vector.extract_strided_slice %22 {offsets = [2, 1], sizes = [1, 1], strides = [1, 1]} : vector<4x9xf32> to vector<1x1xf32>
    %69 = vector.broadcast %68 : vector<1x1xf32> to vector<4x4xf32>
    %70 = arith.mulf %69, %34 : vector<4x4xf32>
    %71 = arith.addf %67, %70 : vector<4x4xf32>
    %72 = vector.extract_strided_slice %22 {offsets = [3, 1], sizes = [1, 1], strides = [1, 1]} : vector<4x9xf32> to vector<1x1xf32>
    %73 = vector.broadcast %72 : vector<1x1xf32> to vector<4x4xf32>
    %74 = arith.mulf %73, %36 : vector<4x4xf32>
    %75 = arith.addf %71, %74 : vector<4x4xf32>
    %c0_29 = arith.constant 0 : index
    %c112 = arith.constant 112 : index
    %76 = vector.load %arg10[%c0_29, %c112] : memref<4x512xf32, #tpu.memory_space<vmem>>, vector<4x256xf32>
    %77 = vector.extract_strided_slice %26 {offsets = [1, 0], sizes = [1, 256], strides = [1, 1]} : vector<9x256xf32> to vector<1x256xf32>
    %78 = vector.broadcast %77 : vector<1x256xf32> to vector<4x256xf32>
    %79 = arith.mulf %76, %78 : vector<4x256xf32>
    %cst_30 = arith.constant dense<0.000000e+00> : vector<4x256xf32>
    %80 = tpu.matmul %75, %79, %cst_30 {dimension_numbers = #tpu.dot_dimension_numbers<[1], [0], [0], [1], [0, 0, 1, 1], [], []>} : vector<4x4xf32>, vector<4x256xf32>, vector<4x256xf32> -> vector<4x256xf32>
    %81 = arith.addf %59, %80 : vector<4x256xf32>
    %82 = vector.extract_strided_slice %22 {offsets = [0, 2], sizes = [1, 1], strides = [1, 1]} : vector<4x9xf32> to vector<1x1xf32>
    %83 = vector.broadcast %82 : vector<1x1xf32> to vector<4x4xf32>
    %84 = arith.mulf %83, %30 : vector<4x4xf32>
    %85 = arith.addf %27, %84 : vector<4x4xf32>
    %86 = vector.extract_strided_slice %22 {offsets = [1, 2], sizes = [1, 1], strides = [1, 1]} : vector<4x9xf32> to vector<1x1xf32>
    %87 = vector.broadcast %86 : vector<1x1xf32> to vector<4x4xf32>
    %88 = arith.mulf %87, %32 : vector<4x4xf32>
    %89 = arith.addf %85, %88 : vector<4x4xf32>
    %90 = vector.extract_strided_slice %22 {offsets = [2, 2], sizes = [1, 1], strides = [1, 1]} : vector<4x9xf32> to vector<1x1xf32>
    %91 = vector.broadcast %90 : vector<1x1xf32> to vector<4x4xf32>
    %92 = arith.mulf %91, %34 : vector<4x4xf32>
    %93 = arith.addf %89, %92 : vector<4x4xf32>
    %94 = vector.extract_strided_slice %22 {offsets = [3, 2], sizes = [1, 1], strides = [1, 1]} : vector<4x9xf32> to vector<1x1xf32>
    %95 = vector.broadcast %94 : vector<1x1xf32> to vector<4x4xf32>
    %96 = arith.mulf %95, %36 : vector<4x4xf32>
    %97 = arith.addf %93, %96 : vector<4x4xf32>
    %c0_31 = arith.constant 0 : index
    %c113 = arith.constant 113 : index
    %98 = vector.load %arg10[%c0_31, %c113] : memref<4x512xf32, #tpu.memory_space<vmem>>, vector<4x256xf32>
    %99 = vector.extract_strided_slice %26 {offsets = [2, 0], sizes = [1, 256], strides = [1, 1]} : vector<9x256xf32> to vector<1x256xf32>
    %100 = vector.broadcast %99 : vector<1x256xf32> to vector<4x256xf32>
    %101 = arith.mulf %98, %100 : vector<4x256xf32>
    %cst_32 = arith.constant dense<0.000000e+00> : vector<4x256xf32>
    %102 = tpu.matmul %97, %101, %cst_32 {dimension_numbers = #tpu.dot_dimension_numbers<[1], [0], [0], [1], [0, 0, 1, 1], [], []>} : vector<4x4xf32>, vector<4x256xf32>, vector<4x256xf32> -> vector<4x256xf32>
    %103 = arith.addf %81, %102 : vector<4x256xf32>
    %104 = vector.extract_strided_slice %22 {offsets = [0, 3], sizes = [1, 1], strides = [1, 1]} : vector<4x9xf32> to vector<1x1xf32>
    %105 = vector.broadcast %104 : vector<1x1xf32> to vector<4x4xf32>
    %106 = arith.mulf %105, %30 : vector<4x4xf32>
    %107 = arith.addf %27, %106 : vector<4x4xf32>
    %108 = vector.extract_strided_slice %22 {offsets = [1, 3], sizes = [1, 1], strides = [1, 1]} : vector<4x9xf32> to vector<1x1xf32>
    %109 = vector.broadcast %108 : vector<1x1xf32> to vector<4x4xf32>
    %110 = arith.mulf %109, %32 : vector<4x4xf32>
    %111 = arith.addf %107, %110 : vector<4x4xf32>
    %112 = vector.extract_strided_slice %22 {offsets = [2, 3], sizes = [1, 1], strides = [1, 1]} : vector<4x9xf32> to vector<1x1xf32>
    %113 = vector.broadcast %112 : vector<1x1xf32> to vector<4x4xf32>
    %114 = arith.mulf %113, %34 : vector<4x4xf32>
    %115 = arith.addf %111, %114 : vector<4x4xf32>
    %116 = vector.extract_strided_slice %22 {offsets = [3, 3], sizes = [1, 1], strides = [1, 1]} : vector<4x9xf32> to vector<1x1xf32>
    %117 = vector.broadcast %116 : vector<1x1xf32> to vector<4x4xf32>
    %118 = arith.mulf %117, %36 : vector<4x4xf32>
    %119 = arith.addf %115, %118 : vector<4x4xf32>
    %c0_33 = arith.constant 0 : index
    %c127 = arith.constant 127 : index
    %120 = vector.load %arg10[%c0_33, %c127] : memref<4x512xf32, #tpu.memory_space<vmem>>, vector<4x256xf32>
    %121 = vector.extract_strided_slice %26 {offsets = [3, 0], sizes = [1, 256], strides = [1, 1]} : vector<9x256xf32> to vector<1x256xf32>
    %122 = vector.broadcast %121 : vector<1x256xf32> to vector<4x256xf32>
    %123 = arith.mulf %120, %122 : vector<4x256xf32>
    %cst_34 = arith.constant dense<0.000000e+00> : vector<4x256xf32>
    %124 = tpu.matmul %119, %123, %cst_34 {dimension_numbers = #tpu.dot_dimension_numbers<[1], [0], [0], [1], [0, 0, 1, 1], [], []>} : vector<4x4xf32>, vector<4x256xf32>, vector<4x256xf32> -> vector<4x256xf32>
    %125 = arith.addf %103, %124 : vector<4x256xf32>
    %126 = vector.extract_strided_slice %22 {offsets = [0, 4], sizes = [1, 1], strides = [1, 1]} : vector<4x9xf32> to vector<1x1xf32>
    %127 = vector.broadcast %126 : vector<1x1xf32> to vector<4x4xf32>
    %128 = arith.mulf %127, %30 : vector<4x4xf32>
    %129 = arith.addf %27, %128 : vector<4x4xf32>
    %130 = vector.extract_strided_slice %22 {offsets = [1, 4], sizes = [1, 1], strides = [1, 1]} : vector<4x9xf32> to vector<1x1xf32>
    %131 = vector.broadcast %130 : vector<1x1xf32> to vector<4x4xf32>
    %132 = arith.mulf %131, %32 : vector<4x4xf32>
    %133 = arith.addf %129, %132 : vector<4x4xf32>
    %134 = vector.extract_strided_slice %22 {offsets = [2, 4], sizes = [1, 1], strides = [1, 1]} : vector<4x9xf32> to vector<1x1xf32>
    %135 = vector.broadcast %134 : vector<1x1xf32> to vector<4x4xf32>
    %136 = arith.mulf %135, %34 : vector<4x4xf32>
    %137 = arith.addf %133, %136 : vector<4x4xf32>
    %138 = vector.extract_strided_slice %22 {offsets = [3, 4], sizes = [1, 1], strides = [1, 1]} : vector<4x9xf32> to vector<1x1xf32>
    %139 = vector.broadcast %138 : vector<1x1xf32> to vector<4x4xf32>
    %140 = arith.mulf %139, %36 : vector<4x4xf32>
    %141 = arith.addf %137, %140 : vector<4x4xf32>
    %c0_35 = arith.constant 0 : index
    %c128_36 = arith.constant 128 : index
    %142 = vector.load %arg10[%c0_35, %c128_36] : memref<4x512xf32, #tpu.memory_space<vmem>>, vector<4x256xf32>
    %143 = vector.extract_strided_slice %26 {offsets = [4, 0], sizes = [1, 256], strides = [1, 1]} : vector<9x256xf32> to vector<1x256xf32>
    %144 = vector.broadcast %143 : vector<1x256xf32> to vector<4x256xf32>
    %145 = arith.mulf %142, %144 : vector<4x256xf32>
    %cst_37 = arith.constant dense<0.000000e+00> : vector<4x256xf32>
    %146 = tpu.matmul %141, %145, %cst_37 {dimension_numbers = #tpu.dot_dimension_numbers<[1], [0], [0], [1], [0, 0, 1, 1], [], []>} : vector<4x4xf32>, vector<4x256xf32>, vector<4x256xf32> -> vector<4x256xf32>
    %147 = arith.addf %125, %146 : vector<4x256xf32>
    %148 = vector.extract_strided_slice %22 {offsets = [0, 5], sizes = [1, 1], strides = [1, 1]} : vector<4x9xf32> to vector<1x1xf32>
    %149 = vector.broadcast %148 : vector<1x1xf32> to vector<4x4xf32>
    %150 = arith.mulf %149, %30 : vector<4x4xf32>
    %151 = arith.addf %27, %150 : vector<4x4xf32>
    %152 = vector.extract_strided_slice %22 {offsets = [1, 5], sizes = [1, 1], strides = [1, 1]} : vector<4x9xf32> to vector<1x1xf32>
    %153 = vector.broadcast %152 : vector<1x1xf32> to vector<4x4xf32>
    %154 = arith.mulf %153, %32 : vector<4x4xf32>
    %155 = arith.addf %151, %154 : vector<4x4xf32>
    %156 = vector.extract_strided_slice %22 {offsets = [2, 5], sizes = [1, 1], strides = [1, 1]} : vector<4x9xf32> to vector<1x1xf32>
    %157 = vector.broadcast %156 : vector<1x1xf32> to vector<4x4xf32>
    %158 = arith.mulf %157, %34 : vector<4x4xf32>
    %159 = arith.addf %155, %158 : vector<4x4xf32>
    %160 = vector.extract_strided_slice %22 {offsets = [3, 5], sizes = [1, 1], strides = [1, 1]} : vector<4x9xf32> to vector<1x1xf32>
    %161 = vector.broadcast %160 : vector<1x1xf32> to vector<4x4xf32>
    %162 = arith.mulf %161, %36 : vector<4x4xf32>
    %163 = arith.addf %159, %162 : vector<4x4xf32>
    %c0_38 = arith.constant 0 : index
    %c129 = arith.constant 129 : index
    %164 = vector.load %arg10[%c0_38, %c129] : memref<4x512xf32, #tpu.memory_space<vmem>>, vector<4x256xf32>
    %165 = vector.extract_strided_slice %26 {offsets = [5, 0], sizes = [1, 256], strides = [1, 1]} : vector<9x256xf32> to vector<1x256xf32>
    %166 = vector.broadcast %165 : vector<1x256xf32> to vector<4x256xf32>
    %167 = arith.mulf %164, %166 : vector<4x256xf32>
    %cst_39 = arith.constant dense<0.000000e+00> : vector<4x256xf32>
    %168 = tpu.matmul %163, %167, %cst_39 {dimension_numbers = #tpu.dot_dimension_numbers<[1], [0], [0], [1], [0, 0, 1, 1], [], []>} : vector<4x4xf32>, vector<4x256xf32>, vector<4x256xf32> -> vector<4x256xf32>
    %169 = arith.addf %147, %168 : vector<4x256xf32>
    %170 = vector.extract_strided_slice %22 {offsets = [0, 6], sizes = [1, 1], strides = [1, 1]} : vector<4x9xf32> to vector<1x1xf32>
    %171 = vector.broadcast %170 : vector<1x1xf32> to vector<4x4xf32>
    %172 = arith.mulf %171, %30 : vector<4x4xf32>
    %173 = arith.addf %27, %172 : vector<4x4xf32>
    %174 = vector.extract_strided_slice %22 {offsets = [1, 6], sizes = [1, 1], strides = [1, 1]} : vector<4x9xf32> to vector<1x1xf32>
    %175 = vector.broadcast %174 : vector<1x1xf32> to vector<4x4xf32>
    %176 = arith.mulf %175, %32 : vector<4x4xf32>
    %177 = arith.addf %173, %176 : vector<4x4xf32>
    %178 = vector.extract_strided_slice %22 {offsets = [2, 6], sizes = [1, 1], strides = [1, 1]} : vector<4x9xf32> to vector<1x1xf32>
    %179 = vector.broadcast %178 : vector<1x1xf32> to vector<4x4xf32>
    %180 = arith.mulf %179, %34 : vector<4x4xf32>
    %181 = arith.addf %177, %180 : vector<4x4xf32>
    %182 = vector.extract_strided_slice %22 {offsets = [3, 6], sizes = [1, 1], strides = [1, 1]} : vector<4x9xf32> to vector<1x1xf32>
    %183 = vector.broadcast %182 : vector<1x1xf32> to vector<4x4xf32>
    %184 = arith.mulf %183, %36 : vector<4x4xf32>
    %185 = arith.addf %181, %184 : vector<4x4xf32>
    %c0_40 = arith.constant 0 : index
    %c143 = arith.constant 143 : index
    %186 = vector.load %arg10[%c0_40, %c143] : memref<4x512xf32, #tpu.memory_space<vmem>>, vector<4x256xf32>
    %187 = vector.extract_strided_slice %26 {offsets = [6, 0], sizes = [1, 256], strides = [1, 1]} : vector<9x256xf32> to vector<1x256xf32>
    %188 = vector.broadcast %187 : vector<1x256xf32> to vector<4x256xf32>
    %189 = arith.mulf %186, %188 : vector<4x256xf32>
    %cst_41 = arith.constant dense<0.000000e+00> : vector<4x256xf32>
    %190 = tpu.matmul %185, %189, %cst_41 {dimension_numbers = #tpu.dot_dimension_numbers<[1], [0], [0], [1], [0, 0, 1, 1], [], []>} : vector<4x4xf32>, vector<4x256xf32>, vector<4x256xf32> -> vector<4x256xf32>
    %191 = arith.addf %169, %190 : vector<4x256xf32>
    %192 = vector.extract_strided_slice %22 {offsets = [0, 7], sizes = [1, 1], strides = [1, 1]} : vector<4x9xf32> to vector<1x1xf32>
    %193 = vector.broadcast %192 : vector<1x1xf32> to vector<4x4xf32>
    %194 = arith.mulf %193, %30 : vector<4x4xf32>
    %195 = arith.addf %27, %194 : vector<4x4xf32>
    %196 = vector.extract_strided_slice %22 {offsets = [1, 7], sizes = [1, 1], strides = [1, 1]} : vector<4x9xf32> to vector<1x1xf32>
    %197 = vector.broadcast %196 : vector<1x1xf32> to vector<4x4xf32>
    %198 = arith.mulf %197, %32 : vector<4x4xf32>
    %199 = arith.addf %195, %198 : vector<4x4xf32>
    %200 = vector.extract_strided_slice %22 {offsets = [2, 7], sizes = [1, 1], strides = [1, 1]} : vector<4x9xf32> to vector<1x1xf32>
    %201 = vector.broadcast %200 : vector<1x1xf32> to vector<4x4xf32>
    %202 = arith.mulf %201, %34 : vector<4x4xf32>
    %203 = arith.addf %199, %202 : vector<4x4xf32>
    %204 = vector.extract_strided_slice %22 {offsets = [3, 7], sizes = [1, 1], strides = [1, 1]} : vector<4x9xf32> to vector<1x1xf32>
    %205 = vector.broadcast %204 : vector<1x1xf32> to vector<4x4xf32>
    %206 = arith.mulf %205, %36 : vector<4x4xf32>
    %207 = arith.addf %203, %206 : vector<4x4xf32>
    %c0_42 = arith.constant 0 : index
    %c144 = arith.constant 144 : index
    %208 = vector.load %arg10[%c0_42, %c144] : memref<4x512xf32, #tpu.memory_space<vmem>>, vector<4x256xf32>
    %209 = vector.extract_strided_slice %26 {offsets = [7, 0], sizes = [1, 256], strides = [1, 1]} : vector<9x256xf32> to vector<1x256xf32>
    %210 = vector.broadcast %209 : vector<1x256xf32> to vector<4x256xf32>
    %211 = arith.mulf %208, %210 : vector<4x256xf32>
    %cst_43 = arith.constant dense<0.000000e+00> : vector<4x256xf32>
    %212 = tpu.matmul %207, %211, %cst_43 {dimension_numbers = #tpu.dot_dimension_numbers<[1], [0], [0], [1], [0, 0, 1, 1], [], []>} : vector<4x4xf32>, vector<4x256xf32>, vector<4x256xf32> -> vector<4x256xf32>
    %213 = arith.addf %191, %212 : vector<4x256xf32>
    %214 = vector.extract_strided_slice %22 {offsets = [0, 8], sizes = [1, 1], strides = [1, 1]} : vector<4x9xf32> to vector<1x1xf32>
    %215 = vector.broadcast %214 : vector<1x1xf32> to vector<4x4xf32>
    %216 = arith.mulf %215, %30 : vector<4x4xf32>
    %217 = arith.addf %27, %216 : vector<4x4xf32>
    %218 = vector.extract_strided_slice %22 {offsets = [1, 8], sizes = [1, 1], strides = [1, 1]} : vector<4x9xf32> to vector<1x1xf32>
    %219 = vector.broadcast %218 : vector<1x1xf32> to vector<4x4xf32>
    %220 = arith.mulf %219, %32 : vector<4x4xf32>
    %221 = arith.addf %217, %220 : vector<4x4xf32>
    %222 = vector.extract_strided_slice %22 {offsets = [2, 8], sizes = [1, 1], strides = [1, 1]} : vector<4x9xf32> to vector<1x1xf32>
    %223 = vector.broadcast %222 : vector<1x1xf32> to vector<4x4xf32>
    %224 = arith.mulf %223, %34 : vector<4x4xf32>
    %225 = arith.addf %221, %224 : vector<4x4xf32>
    %226 = vector.extract_strided_slice %22 {offsets = [3, 8], sizes = [1, 1], strides = [1, 1]} : vector<4x9xf32> to vector<1x1xf32>
    %227 = vector.broadcast %226 : vector<1x1xf32> to vector<4x4xf32>
    %228 = arith.mulf %227, %36 : vector<4x4xf32>
    %229 = arith.addf %225, %228 : vector<4x4xf32>
    %c0_44 = arith.constant 0 : index
    %c145 = arith.constant 145 : index
    %230 = vector.load %arg10[%c0_44, %c145] : memref<4x512xf32, #tpu.memory_space<vmem>>, vector<4x256xf32>
    %231 = vector.extract_strided_slice %26 {offsets = [8, 0], sizes = [1, 256], strides = [1, 1]} : vector<9x256xf32> to vector<1x256xf32>
    %232 = vector.broadcast %231 : vector<1x256xf32> to vector<4x256xf32>
    %233 = arith.mulf %230, %232 : vector<4x256xf32>
    %cst_45 = arith.constant dense<0.000000e+00> : vector<4x256xf32>
    %234 = tpu.matmul %229, %233, %cst_45 {dimension_numbers = #tpu.dot_dimension_numbers<[1], [0], [0], [1], [0, 0, 1, 1], [], []>} : vector<4x4xf32>, vector<4x256xf32>, vector<4x256xf32> -> vector<4x256xf32>
    %235 = arith.addf %213, %234 : vector<4x256xf32>
    %c0_46 = arith.constant 0 : index
    %c0_47 = arith.constant 0 : index
    %236 = vector.load %arg8[%c0_46, %c0_47] : memref<4x1xf32, #tpu.memory_space<vmem>>, vector<4x1xf32>
    %237 = vector.broadcast %236 : vector<4x1xf32> to vector<4x256xf32>
    %238 = arith.addf %235, %237 : vector<4x256xf32>
    %c0_48 = arith.constant 0 : index
    %c0_49 = arith.constant 0 : index
    %239 = vector.load %arg9[%c0_48, %c0_49] : memref<4x256xf32, #tpu.memory_space<vmem>>, vector<4x256xf32>
    tpu.vector_store %arg9[%c0_48, %c0_49], %238 {strides = array<i32>} : memref<4x256xf32, #tpu.memory_space<vmem>>, vector<4x256xf32>,
    return
  }
}

</mosaic_0001>

<bundles_post_ra>
// kernel: tpu_custom_call.1
= control target key start
LH: loop header
LB: loop body
LE: loop exit
PB: predicated region body
PF: predicated region fallthrough
CT: control target
= control target key end

     0   :  { %vm44_vm0 = vcmask 1040384   ;;  %v516_v3 = vlaneseq  ;;  %vm2010_vm1 = vmmov 1   ;;  %v2011_v8 = vmov 0.0   ;;  %s2565_s0 = inlined_call_operand.vmem [shape: f32[17,256], index: 0, kind: input, shape index: {}]   ;;  %s2566_s1 = inlined_call_operand.vmem [shape: f32[9,256], index: 1, kind: input, shape index: {}]   ;;  %s2567_s2 = inlined_call_operand.vmem [shape: f32[4,17], index: 2, kind: input, shape index: {}]   ;;  %s2568_s3 = inlined_call_operand.vmem [shape: f32[8,9], index: 3, kind: input, shape index: {}]   ;;  %s2569_s4 = inlined_call_operand.vmem [shape: f32[4,4,4], index: 4, kind: input, shape index: {}]   ;;  %s2570_s5 = inlined_call_operand.vmem [shape: f32[4,4], index: 5, kind: input, shape index: {}]   ;;  %s2571_s6 = inlined_call_operand.vmem [shape: f32[256,9], index: 6, kind: input, shape index: {}]   ;;  %s2572_s7 = inlined_call_operand.vmem [shape: f32[9,256], index: 7, kind: input, shape index: {}]   ;;  %s2573_s8 = inlined_call_operand.vmem [shape: f32[4,1], index: 8, kind: input, shape index: {}]   ;;  %s2574_s9 = inlined_call_operand.hbm [shape: f32[4,256], index: 9, kind: output, shape index: {}]  }
   0x1   :  { %v35_v0 = vld [vmem:[%s2565_s0 + $0x8] sm:$0xff]  ;;  %v37_v1 = vld [vmem:[%s2565_s0 + $0x18] sm:$0xff]  ;;  %vm2092_vm2 = vmpackc.low %vm44_vm0, %vm2010_vm1  ;;  %201 = vmatprep.mubr.f32.mxu1 %v2011_v8  ;;  %476 = vst [vmem:[#allocation2] sm:$0xff] %v2011_v8  ;;  %115 = vmatprep.mubr.f32.mxu0 %v2011_v8  ;;  %vm127_vm3 = vcmask 72704  }
   0x2   :  { %v124_v2 = vld [vmem:[%s2566_s1 + $0x8] sm:$0xff]  ;;  %v1831_v4 = vpack.c.bf16 %v37_v1, %v35_v0  ;;  %v126_v5 = vld [vmem:[%s2566_s1 + $0x18] sm:$0x1]  ;;  %v34_v7 = vld [vmem:[%s2565_s0] sm:$0xff]  ;;  %477 = vst [vmem:[#allocation2 + $0x8] sm:$0xff] %v2011_v8  ;;  %v2112_v13 = vshrl.u32 %v516_v3, 7 }
   0x3   :  { %v1835_v9 = vpack.c.bf16 %v126_v5, %v124_v2  ;;  %v36_v10 = vld [vmem:[%s2565_s0 + $0x10] sm:$0xff]  ;;  %v123_v11 = vld [vmem:[%s2566_s1] sm:$0xff]  ;;  %v39_v16 = vld [vmem:[%s2565_s0 + $0x28] sm:$0x1] }
   0x4   :  { %v125_v12 = vld [vmem:[%s2566_s1 + $0x10] sm:$0x1]  ;;  %1832 = vmatprep.subr.bf16.mxu0 %v1831_v4  ;;  %v1833_v14 = vpack.c.bf16 %v36_v10, %v34_v7  ;;  %v2122_v17 = vld [vmem:[%s2572_s7] sm:$0xff]  ;;  %v2127_v18 = vld [vmem:[%s2572_s7 + $0x8] sm:$0xff]  ;;  %v566_v19 = vsub.s32 1, %v2112_v13  ;;  %v795_v20 = vsub.s32 2, %v2112_v13 }
   0x5   :  { %v1838_v15 = vpack.c.bf16 %v125_v12, %v123_v11  ;;  %1837 = vmatprep.subr.msk.bf16.mxu1 %vm2092_vm2, %v1835_v9  ;;  %v122_v21 = vld [vmem:[%s2568_s3] sm:$0xff]  ;;  %v937_v22 = vsub.s32 3, %v2112_v13 }
   0x6   :  { %1834 = vmatpush1.bf16.msra.mxu0 %v1833_v14 }
   0x7   :  { %1840 = vmatpush1.bf16.msk.msra.mxu1 %vm2092_vm2, %v1838_v15 }
   0x8   :  { %14 = vsyncpa [#allocation4], 0  ;;  %1758 = vmatprep.subr.msk.mxu0 %vm44_vm0, %v39_v16  ;;  %v38_v23 = vld [vmem:[%s2565_s0 + $0x20] sm:$0x1]  ;;  %v567_v24 = vrot.slane %v2122_v17, %v566_v19  ;;  %v571_v25 = vrot.slane %v2127_v18, %v566_v19  ;;  %v796_v26 = vrot.slane %v2122_v17, %v795_v20  ;;  %v800_v27 = vrot.slane %v2127_v18, %v795_v20  ;;  %s2012_s0 = smov 112   ;;  %s2013_s14 = smov 113  }
   0x9   :  { %v33_v28 = vld [vmem:[%s2567_s2] sm:$0xf]  ;;  %vm40_vm4 = vcmask 138240   ;;  %v938_v31 = vrot.slane %v2122_v17, %v937_v22  ;;  %v942_v32 = vrot.slane %v2127_v18, %v937_v22  ;;  %s2014_s2 = smov 127   ;;  %vm298_vm5 = vcmask 1043456   ;;  %s2015_s15 = smov 111  }
   0xa   :  { %1763 = vmatmul.mubr.msk.f32.vlgmr.msra.gmra.mrb[0].mxu1 %vm127_vm3, %v122_v21  ;;  %v574_v29 = vcombine.low %v567_v24, %v571_v25  ;;  %1759 = vmatpush1.msk.msra.mxu0 %vm44_vm0, %v38_v23  ;;  %v803_v30 = vcombine.low %v796_v26, %v800_v27  ;;  %vm278_vm6 = vcmask 27648   ;;  %v518_v49 = vsub.s32 0, %v2112_v13  ;;  %s2016_s16 = smov 1   ;;  %v390_v57 = vld [vmem:[%s2571_s6 + $0x80] sm:$0xff]  ;;  %v391_v58 = vld [vmem:[%s2571_s6 + $0x88] sm:$0xff]  ;;  %v392_v63 = vld [vmem:[%s2571_s6 + $0x90] sm:$0xff] }
   0xb   :  { %1760 = vmatmul.mubr.msk.f32.vlgmr.msra.gmra.mrb[0].mxu0 %vm40_vm4, %v33_v28  ;;  %v945_v33 = vcombine.low %v938_v31, %v942_v32  ;;  %v1203_v52 = vsub.s32 5, %v2112_v13  ;;  %v1841_v59 = vpack.c.bf16 %v391_v58, %v390_v57  ;;  %v374_v61 = vld [vmem:[%s2571_s6] sm:$0xff]  ;;  %v375_v62 = vld [vmem:[%s2571_s6 + $0x8] sm:$0xff]  ;;  %v393_v0 = vld [vmem:[%s2571_s6 + $0x98] sm:$0xff]  ;;  %vm294_vm7 = vcmask 31744   ;;  %s2018_s21 = smov 16  }
   0xc   :  { %575 = vrot.lane.b32.xlu1 %v574_v29, %s2012_s0  ;;  %667 = vmatprep.mubr.f32.mxu0 %v2011_v8  ;;  %v519_v50 = vrot.slane %v2122_v17, %v518_v49  ;;  %v523_v51 = vrot.slane %v2127_v18, %v518_v49  ;;  %v1843_v2 = vpack.c.bf16 %v375_v62, %v374_v61  ;;  %v376_v5 = vld [vmem:[%s2571_s6 + $0x10] sm:$0xff]  ;;  %v377_v6 = vld [vmem:[%s2571_s6 + $0x18] sm:$0xff]  ;;  %v394_v7 = vld [vmem:[%s2571_s6 + $0xa0] sm:$0xff]  ;;  %vm578_vm8 = vcmask 916480   ;;  %s2019_s22 = smov 126   ;;  %s2020_s23 = smov 121  }
   0xd   :  { %v1204_v54 = vrot.slane %v2122_v17, %v1203_v52  ;;  %v1208_v55 = vrot.slane %v2127_v18, %v1203_v52  ;;  %v1845_v4 = vpack.c.bf16 %v393_v0, %v392_v63  ;;  %v395_v9 = vld [vmem:[%s2571_s6 + $0xa8] sm:$0xff]  ;;  %v1847_v10 = vpack.c.bf16 %v377_v6, %v376_v5  ;;  %v378_v12 = vld [vmem:[%s2571_s6 + $0x20] sm:$0xff]  ;;  %v396_v15 = vld [vmem:[%s2571_s6 + $0xb0] sm:$0xff]  ;;  %s2021_s24 = smov 125   ;;  %s2022_s25 = smov 124  }
   0xe   :  { %v526_v53 = vcombine.low %v519_v50, %v523_v51  ;;  %v1849_v11 = vpack.c.bf16 %v395_v9, %v394_v7  ;;  %v379_v14 = vld [vmem:[%s2571_s6 + $0x28] sm:$0xff]  ;;  %v397_v16 = vld [vmem:[%s2571_s6 + $0xb8] sm:$0xff]  ;;  %v380_v21 = vld [vmem:[%s2571_s6 + $0x30] sm:$0xff]  ;;  %v1343_v5 = vsub.s32 6, %v2112_v13  ;;  %s2023_s26 = smov 15   ;;  %s2024_s1 = smov 122  }
   0xf   :  { %v1211_v56 = vcombine.low %v1204_v54, %v1208_v55  ;;  %v1851_v19 = vpack.c.bf16 %v379_v14, %v378_v12  ;;  %v1853_v20 = vpack.c.bf16 %v397_v16, %v396_v15  ;;  %v381_v22 = vld [vmem:[%s2571_s6 + $0x38] sm:$0xff]  ;;  %v398_v23 = vld [vmem:[%s2571_s6 + $0xc0] sm:$0xff]  ;;  %v399_v24 = vld [vmem:[%s2571_s6 + $0xc8] sm:$0xff]  ;;  %v1483_v55 = vsub.s32 7, %v2112_v13  ;;  %s2025_s10 = smov 120   ;;  %s2026_s11 = smov 17  }
  0x10   :  { %804 = vrot.lane.b32.xlu1 %v803_v30, %s2013_s14  ;;  %v1855_v25 = vpack.c.bf16 %v381_v22, %v380_v21  ;;  %v1857_v26 = vpack.c.bf16 %v399_v24, %v398_v23  ;;  %v382_v27 = vld [vmem:[%s2571_s6 + $0x40] sm:$0xff]  ;;  %v383_v28 = vld [vmem:[%s2571_s6 + $0x48] sm:$0xff]  ;;  %v400_v29 = vld [vmem:[%s2571_s6 + $0xd0] sm:$0xff]  ;;  %v1344_v6 = vrot.slane %v2122_v17, %v1343_v5  ;;  %v1348_v7 = vrot.slane %v2127_v18, %v1343_v5 }
  0x11   :  { %v401_v30 = vld [vmem:[%s2571_s6 + $0xd8] sm:$0xff]  ;;  %v1859_v31 = vpack.c.bf16 %v383_v28, %v382_v27  ;;  %v1484_v57 = vrot.slane %v2122_v17, %v1483_v55  ;;  %v1488_v58 = vrot.slane %v2127_v18, %v1483_v55  ;;  %vm530_vm9 = vcmask 908288  }
  0x12   :  { %v1861_v32 = vpack.c.bf16 %v401_v30, %v400_v29  ;;  %v389_v49 = vld [vmem:[%s2571_s6 + $0x78] sm:$0xff]  ;;  %v1351_v9 = vcombine.low %v1344_v6, %v1348_v7  ;;  %vm949_vm10 = vcmask 1039360   ;;  %vm807_vm11 = vcmask 924672  }
  0x13   :  { %v1491_v0 = vcombine.low %v1484_v57, %v1488_v58  ;;  %vm964_vm12 = vcmask 7168   ;;  %vm593_vm13 = vcmask 130048   ;;  %vm822_vm14 = vcmask 121856  }
  0x14   :  { %946 = vrot.lane.b32.xlu1 %v945_v33, %s2014_s2  ;;  %v384_v33 = vld [vmem:[%s2571_s6 + $0x50] sm:$0xff] }
  0xdd   :  { %v203_v34 = vpop.f32.mrb[0].mxu1 }
  0xde   :  { %v205_v35 = vpop.f32.mrb[1].mxu1  ;;  %v2158_v38 = vpop.f32.mrb[0].mxu0  ;;  %v292_v40 = vrot.slane %v203_v34, 4 }
  0xdf   :  { %v293_v36 = vrot.slane %v205_v35, 4  ;;  %v2156_v37 = vcombine.high %v203_v34, %v205_v35  ;;  %208 = vmatprep.subr.mxu1 %v205_v35  ;;  %v2160_v39 = vpop.f32.mrb[1].mxu0  ;;  %v402_v35 = vld [vmem:[%s2571_s6 + $0xe0] sm:$0xff] }
  0xe0   :  { %209 = vmatpush1.xpose.msra.mxu1 %v203_v34  ;;  %272 = vmatprep.mubr.f32.mxu1 %v2160_v39  ;;  %v385_v34 = vld [vmem:[%s2571_s6 + $0x58] sm:$0xff] }
  0xe1   :  { %480 = vst [vmem:[#allocation2 + $0x4] sm:$0xff] %v2156_v37  ;;  %1764 = vmatprep.subr.msk.mxu1 %vm298_vm5, %v293_v36  ;;  %v403_v36 = vld [vmem:[%s2571_s6 + $0xe8] sm:$0xff] }
  0xe3   :  { %273 = vmatmul.mubr.f32.vlgmr.msra.gmra.mrb[2].mxu1 %v2158_v38 }
  0xe4   :  { %1765 = vmatpush1.msk.msra.mxu1 %vm298_vm5, %v292_v40  ;;  %367 = vmatprep.mubr.f32.mxu1 %v2011_v8  ;;  %v1863_v40 = vpack.c.bf16 %v385_v34, %v384_v33  ;;  %v1200_v34 = vld [vmem:[#allocation2 + $0xc] sm:$0xf] }
  0xe5   :  { %1842 = vmatprep.subr.bf16.mxu1 %v1841_v59 }
  0xe8   :  { %v515_v14 = vld [vmem:[#allocation2 + $0x8] sm:$0xf] }
  0xe9   :  { %v792_v27 = vld [vmem:[#allocation2 + $0x8] sm:$0xf] }
 0x1b6   :  { %v274_v41 = vpop.f32.mrb[2].mxu1 }
 0x1b7   :  { %v276_v42 = vpop.f32.mrb[3].mxu1  ;;  %v279_v43 = vsel %vm278_vm6, %v274_v41, -inf }
 0x1b8   :  { %280 = vmax.xlane.f32.xlu0 %v279_v43  ;;  %v386_v42 = vld [vmem:[%s2571_s6 + $0x60] sm:$0xff]  ;;  %v387_v43 = vld [vmem:[%s2571_s6 + $0x68] sm:$0xff] }
 0x245   :  { %v281_v44 = vpop.xlane.xlu0 %280 }
 0x246   :  { %v282_v45 = vsub.f32 %v274_v41, %v281_v44  ;;  %v1865_v41 = vpack.c.bf16 %v403_v36, %v402_v35  ;;  %v1867_v44 = vpack.c.bf16 %v387_v43, %v386_v42  ;;  %v934_v43 = vld [vmem:[#allocation2 + $0x8] sm:$0xf] }
 0x248   :  { %v283_v46 = vmul.f32 1.442695, %v282_v45  ;;  %v404_v45 = vld [vmem:[%s2571_s6 + $0xf0] sm:$0xff] }
 0x24a   :  { %1982 = vpow2.f32 %v283_v46  ;;  %v405_v46 = vld [vmem:[%s2571_s6 + $0xf8] sm:$0xff] }
 0x254   :  { %v1983_v47 = vpop.eup %1982 }
 0x255   :  { %v285_v48 = vsel %vm278_vm6, %v1983_v47, 0.0 }
 0x256   :  { %286 = vadd.xlane.f32.xlu0 %v285_v48  ;;  %v388_v48 = vld [vmem:[%s2571_s6 + $0x70] sm:$0xff]  ;;  %s2017_s6 = smov 123  }
 0x257   :  { %v1871_v50 = vpack.c.bf16 %v389_v49, %v388_v48 }
 0x26c   :  { %527 = vrot.lane.b32.xlu0 %v526_v53, %s2015_s15 }
 0x270   :  { %1212 = vrot.lane.b32.xlu0 %v1211_v56, %s2016_s16 }
 0x2e3   :  { %v287_v60 = vpop.xlane.xlu0 %286 }
 0x2e4   :  { %1984 = vrcp.f32 %v287_v60  ;;  %v576_v60 = vpop.permute.xlu1 %575 }
 0x2e5   :  { %v577_v62 = vrot.slane %v576_v60, 4 }
 0x2e7   :  { %v583_v15 = vmul.f32 %v577_v62, %v515_v14  ;;  %v528_v16 = vpop.permute.xlu0 %527 }
 0x2eb   :  { %v1213_v33 = vpop.permute.xlu0 %1212 }
 0x2ec   :  { %v1214_v35 = vrot.slane %v1213_v33, 4 }
 0x2ee   :  { %v1985_v1 = vpop.eup %1984  ;;  %v1219_v36 = vmul.f32 %v1214_v35, %v1200_v34 }
 0x2ef   :  { %v289_v3 = vmul.f32 %v1985_v1, %v1983_v47  ;;  %v1869_v47 = vpack.c.bf16 %v405_v46, %v404_v45  ;;  %v579_v1 = vsel %vm578_vm8, %v577_v62, %v576_v60 }
 0x2f1   :  { %1766 = vmatmul.mubr.msk.f32.vlgmr.msra.gmra.mrb[4].mxu1 %vm294_vm7, %v289_v3 }
 0x2f2   :  { %1844 = vmatpush3.bf16.msra.mxu1 %v1843_v2  ;;  %v2288_v2 = vld [vmem:[#allocation2] sm:$0xff] }
 0x2f3   :  { %1846 = vmatprep.subr.bf16.mxu1 %v1845_v4  ;;  %v582_v3 = vmul.f32 %v2288_v2, %v579_v1 }
 0x2f5   :  { %v586_v4 = vcombine.high %v582_v3, %v582_v3 }
 0x2f6   :  { %1848 = vmatpush3.bf16.msra.mxu1 %v1847_v10  ;;  %v1791_v10 = vld [vmem:[%s2572_s7 + $0x10] ss:$0 sm:$0xff] }
 0x2f7   :  { %1850 = vmatprep.subr.bf16.mxu1 %v1849_v11  ;;  %v1792_v11 = vld [vmem:[%s2572_s7 + $0x18] ss:$0 sm:$0xff] }
 0x2f8   :  { %v1631_v12 = vcombine.low %v1791_v10, %v1792_v11 }
 0x2fa   :  { %1852 = vmatpush3.bf16.msra.mxu1 %v1851_v19  ;;  %v805_v19 = vpop.permute.xlu1 %804 }
 0x2fb   :  { %1854 = vmatprep.subr.bf16.mxu1 %v1853_v20  ;;  %v529_v20 = vrot.slane %v528_v16, 4 }
 0x2fd   :  { %v535_v21 = vmul.f32 %v529_v20, %v515_v14  ;;  %v531_v22 = vsel %vm530_vm9, %v529_v20, %v528_v16  ;;  %v1480_v16 = vld [vmem:[#allocation2 + $0xc] sm:$0xf] }
 0x2fe   :  { %1856 = vmatpush3.bf16.msra.mxu1 %v1855_v25  ;;  %v947_v23 = vpop.permute.xlu1 %946  ;;  %v534_v24 = vmul.f32 %v2288_v2, %v531_v22 }
 0x2ff   :  { %1858 = vmatprep.subr.bf16.mxu1 %v1857_v26  ;;  %v948_v25 = vrot.slane %v947_v23, 4  ;;  %v806_v26 = vrot.slane %v805_v19, 4 }
 0x301   :  { %v950_v28 = vsel %vm949_vm10, %v948_v25, %v947_v23  ;;  %v812_v29 = vmul.f32 %v806_v26, %v792_v27  ;;  %v954_v45 = vmul.f32 %v948_v25, %v934_v43 }
 0x302   :  { %1860 = vmatpush3.bf16.msra.mxu1 %v1859_v31  ;;  %v953_v30 = vmul.f32 %v950_v28, %v2288_v2 }
 0x303   :  { %1862 = vmatprep.subr.bf16.mxu1 %v1861_v32  ;;  %v676_v32 = vcombine.high %v534_v24, %v534_v24 }
 0x304   :  { %v957_v31 = vcombine.high %v953_v30, %v953_v30 }
 0x306   :  { %1864 = vmatpush3.bf16.msra.mxu1 %v1863_v40  ;;  %v808_v40 = vsel %vm807_vm11, %v806_v26, %v805_v19 }
 0x307   :  { %1866 = vmatprep.subr.bf16.mxu1 %v1865_v41  ;;  %v811_v41 = vmul.f32 %v808_v40, %v2288_v2 }
 0x309   :  { %v815_v42 = vcombine.high %v811_v41, %v811_v41 }
 0x30a   :  { %1868 = vmatpush3.bf16.msra.mxu1 %v1867_v44  ;;  %v1215_v44 = vsel %vm964_vm12, %v1214_v35, %v1213_v33 }
 0x30b   :  { %1870 = vmatprep.subr.bf16.mxu1 %v1869_v47  ;;  %v1218_v46 = vmul.f32 %v1215_v44, %v2156_v37  ;;  %v2429_v44 = vld [vmem:[%s2569_s4] sm:$0xf] }
 0x30d   :  { %v1222_v47 = vcombine.high %v1218_v46, %v1218_v46 }
 0x30e   :  { %1872 = vmatpush3.bf16.msra.mxu1 %v1871_v50 }
 0x3c4   :  { %v369_v51 = vpop.f32.mrb[4].mxu1 }
 0x3c5   :  { %v370_v52 = vadd.f32 %v369_v51, %v2158_v38  ;;  %v371_v53 = vpop.f32.mrb[5].mxu1 }
 0x3c6   :  { %v372_v54 = vadd.f32 %v371_v53, %v2160_v39 }
 0x3c8   :  { %470 = vmatprep.mubr.f32.mxu1 %v372_v54 }
 0x3c9   :  { %471 = vmatmul.mubr.f32.vlgmr.msra.gmra.mrb[6].mxu1 %v370_v52 }
 0x49c   :  { %v1828_v56 = vpop.f32.mrb[6].mxu1 }
 0x49d   :  { %v1829_v59 = vpop.f32.mrb[7].mxu1 }
 0x49e   :  { %v1830_v61 = vadd.f32 %v1829_v59, %v1828_v56 }
 0x4a0   :  { %1171 = vrot.lane.b32.xlu0 %v1830_v61, %s2017_s6  ;;  %536 = vrot.lane.b32.xlu1 %v1830_v61, %s2014_s2  ;;  %1889 = vpush %v1830_v61  ;;  %v2280_v38 = vrot.slane %v1830_v61, 1  ;;  %v2282_v39 = vrot.slane %v1830_v61, 2  ;;  %v2284_v63 = vrot.slane %v1830_v61, 3 }
 0x4a2   :  { %1891 = vpush %v2280_v38 }
 0x4a3   :  { %1893 = vpush %v2282_v39 }
 0x4a4   :  { %1895 = vpush %v2284_v63  ;;  %1492 = vrot.lane.b32.xlu0 %v1491_v0, %s2018_s21  ;;  %763 = vrot.lane.b32.xlu1 %v1830_v61, %s2019_s22 }
 0x4a8   :  { %1451 = vrot.lane.b32.xlu0 %v1830_v61, %s2020_s23  ;;  %905 = vrot.lane.b32.xlu1 %v1830_v61, %s2021_s24 }
 0x4ac   :  { %589 = vrot.lane.b32.xlu0 %v586_v4, %s2018_s21  ;;  %1047 = vrot.lane.b32.xlu1 %v1830_v61, %s2022_s25 }
 0x4b0   :  { %770 = vrot.lane.b32.xlu0 %v2280_v38, %s2019_s22  ;;  %543 = vrot.lane.b32.xlu1 %v2280_v38, %s2014_s2 }
 0x4b4   :  { %784 = vrot.lane.b32.xlu0 %v2284_v63, %s2019_s22  ;;  %550 = vrot.lane.b32.xlu1 %v2282_v39, %s2014_s2 }
 0x4b8   :  { %912 = vrot.lane.b32.xlu0 %v2280_v38, %s2021_s24  ;;  %557 = vrot.lane.b32.xlu1 %v2284_v63, %s2014_s2 }
 0x4bc   :  { %926 = vrot.lane.b32.xlu0 %v2284_v63, %s2021_s24  ;;  %1352 = vrot.lane.b32.xlu1 %v1351_v9, %s2023_s26 }
 0x4c0   :  { %1061 = vrot.lane.b32.xlu0 %v2282_v39, %s2022_s25  ;;  %1311 = vrot.lane.b32.xlu1 %v1830_v61, %s2024_s1 }
 0x4c4   :  { %1591 = vrot.lane.b32.xlu0 %v1830_v61, %s2025_s10  ;;  %1632 = vrot.lane.b32.xlu1 %v1631_v12, %s2026_s11 }
 0x4c8   :  { %1178 = vrot.lane.b32.xlu0 %v2280_v38, %s2017_s6  ;;  %777 = vrot.lane.b32.xlu1 %v2282_v39, %s2019_s22 }
 0x4cc   :  { %1192 = vrot.lane.b32.xlu0 %v2284_v63, %s2017_s6  ;;  %591 = vrot.lane.b32.xlu1 %v583_v15, %s2018_s21  ;;  %v1620_v15 = vld [vmem:[#allocation2 + $0xc] sm:$0xf] }
 0x4d0   :  { %1325 = vrot.lane.b32.xlu0 %v2282_v39, %s2024_s1  ;;  %919 = vrot.lane.b32.xlu1 %v2282_v39, %s2021_s24 }
 0x4d4   :  { %1458 = vrot.lane.b32.xlu0 %v2280_v38, %s2020_s23  ;;  %1054 = vrot.lane.b32.xlu1 %v2280_v38, %s2022_s25 }
 0x4d8   :  { %1465 = vrot.lane.b32.xlu0 %v2282_v39, %s2020_s23  ;;  %1068 = vrot.lane.b32.xlu1 %v2284_v63, %s2022_s25 }
 0x4dc   :  { %681 = vrot.lane.b32.xlu0 %v535_v21, %s2026_s11  ;;  %587 = vrot.lane.b32.xlu1 %v582_v3, %s2018_s21 }
 0x4e0   :  { %677 = vrot.lane.b32.xlu0 %v534_v24, %s2026_s11  ;;  %1185 = vrot.lane.b32.xlu1 %v2282_v39, %s2017_s6 }
 0x4e4   :  { %1612 = vrot.lane.b32.xlu0 %v2284_v63, %s2025_s10  ;;  %1318 = vrot.lane.b32.xlu1 %v2280_v38, %s2024_s1 }
 0x4e8   :  { %820 = vrot.lane.b32.xlu0 %v812_v29, %s2023_s26  ;;  %1332 = vrot.lane.b32.xlu1 %v2284_v63, %s2024_s1  ;;  %v2027_v29 = vmov 0  }
 0x4e9   :  { %1980 = vset.pattern.permute.xlu1 %v2027_v29  ;;  %1981 = vset.pattern.permute.xlu0 %v2027_v29 }
 0x4ec   :  { %960 = vrot.lane.b32.xlu0 %v957_v31, %s2016_s16  ;;  %679 = vrot.lane.b32.xlu1 %v676_v32, %s2026_s11 }
 0x4f0   :  { %958 = vrot.lane.b32.xlu0 %v953_v30, %s2016_s16  ;;  %1472 = vrot.lane.b32.xlu1 %v2284_v63, %s2020_s23  ;;  %v1340_v63 = vld [vmem:[#allocation2 + $0xc] sm:$0xf]  ;;  %v1731_v30 = vld [vmem:[%s2573_s8] sm:$0xf]  ;;  %s2028_s23 = smov [#allocation3]  }
 0x4f1   :  { %s1750_s24 = sshll.u32 %s2028_s23, 4  ;;  %s1751_s24 = int_to_ptr.vmem [resolvable:$true] %s1750_s24 }
 0x4f2   :  { %p1991_p1 = scmp.lt.s32.totalorder %s1751_s24, %s1751_s24 }
 0x4f4   :  { %1598 = vrot.lane.b32.xlu1 %v2280_v38, %s2025_s10  ;;  %1227 = vrot.lane.b32.xlu0 %v1219_v36, %s2014_s2 }
 0x4f8   :  { %1605 = vrot.lane.b32.xlu1 %v2282_v39, %s2025_s10 }
 0x4fc   :  { %818 = vrot.lane.b32.xlu1 %v815_v42, %s2023_s26 }
 0x500   :  { %816 = vrot.lane.b32.xlu1 %v811_v41, %s2023_s26 }
 0x504   :  { %962 = vrot.lane.b32.xlu1 %v954_v45, %s2016_s16 }
 0x508   :  { %1225 = vrot.lane.b32.xlu1 %v1222_v47, %s2014_s2 }
 0x50c   :  { %1223 = vrot.lane.b32.xlu1 %v1218_v46, %s2014_s2 }
 0x512   :  { %v2382_v48 = vpop.permute.xlu0 %1171  ;;  %v537_v49 = vpop.permute.xlu1 %536 }
 0x513   :  { %1897 = vpush %v537_v49  ;;  %v2436_v49 = vld [vmem:[%s2569_s4 + $0x4] sm:$0xf] }
 0x516   :  { %v1493_v50 = vpop.permute.xlu0 %1492  ;;  %v764_v51 = vpop.permute.xlu1 %763 }
 0x517   :  { %v1494_v60 = vrot.slane %v1493_v50, 4 }
 0x519   :  { %v1495_v38 = vsel %vm593_vm13, %v1494_v60, %v1493_v50  ;;  %v1499_v23 = vmul.f32 %v1494_v60, %v1480_v16 }
 0x51a   :  { %v2384_v52 = vpop.permute.xlu0 %1451  ;;  %v906_v53 = vpop.permute.xlu1 %905  ;;  %v1498_v2 = vmul.f32 %v1495_v38, %v2156_v37 }
 0x51c   :  { %v1502_v10 = vcombine.high %v1498_v2, %v1498_v2 }
 0x51e   :  { %v2386_v54 = vpop.permute.xlu0 %589  ;;  %v2388_v55 = vpop.permute.xlu1 %1047 }
 0x522   :  { %v771_v56 = vpop.permute.xlu0 %770  ;;  %v544_v57 = vpop.permute.xlu1 %543 }
 0x523   :  { %1899 = vpush %v544_v57 }
 0x526   :  { %v785_v58 = vpop.permute.xlu0 %784  ;;  %v551_v59 = vpop.permute.xlu1 %550 }
 0x527   :  { %1901 = vpush %v551_v59 }
 0x52a   :  { %v913_v61 = vpop.permute.xlu0 %912  ;;  %v558_v62 = vpop.permute.xlu1 %557 }
 0x52b   :  { %1903 = vpush %v558_v62 }
 0x52c   :  { %1905 = vpush %v764_v51 }
 0x52d   :  { %1907 = vpush %v771_v56  ;;  %v2449_v56 = vld [vmem:[%s2569_s4 + $0x8] sm:$0xf] }
 0x52e   :  { %v927_v39 = vpop.permute.xlu0 %926  ;;  %v1353_v0 = vpop.permute.xlu1 %1352 }
 0x52f   :  { %v1354_v1 = vrot.slane %v1353_v0, 4 }
 0x531   :  { %v1355_v3 = vsel %vm822_vm14, %v1354_v1, %v1353_v0  ;;  %v1359_v4 = vmul.f32 %v1354_v1, %v1340_v63 }
 0x532   :  { %v1358_v5 = vmul.f32 %v1355_v3, %v2156_v37  ;;  %v1062_v6 = vpop.permute.xlu0 %1061  ;;  %v2394_v7 = vpop.permute.xlu1 %1311 }
 0x533   :  { %1367 = vrot.lane.b32.xlu1 %v1359_v4, %s2013_s14 }
 0x534   :  { %v1362_v9 = vcombine.high %v1358_v5, %v1358_v5 }
 0x536   :  { %v2397_v11 = vpop.permute.xlu0 %1591  ;;  %1365 = vrot.lane.b32.xlu0 %v1362_v9, %s2013_s14  ;;  %v1633_v12 = vpop.permute.xlu1 %1632 }
 0x537   :  { %v1634_v14 = vrot.slane %v1633_v12, 4  ;;  %1505 = vrot.lane.b32.xlu1 %v1502_v10, %s2012_s0 }
 0x539   :  { %v1635_v19 = vsel %vm40_vm4, %v1634_v14, %v1633_v12  ;;  %v1639_v22 = vmul.f32 %v1634_v14, %v1620_v15 }
 0x53a   :  { %v1179_v20 = vpop.permute.xlu0 %1178  ;;  %1363 = vrot.lane.b32.xlu0 %v1358_v5, %s2013_s14  ;;  %v778_v21 = vpop.permute.xlu1 %777  ;;  %v1638_v24 = vmul.f32 %v1635_v19, %v2156_v37 }
 0x53b   :  { %1503 = vrot.lane.b32.xlu1 %v1498_v2, %s2012_s0  ;;  %1909 = vpush %v778_v21 }
 0x53c   :  { %1911 = vpush %v785_v58  ;;  %v1642_v28 = vcombine.high %v1638_v24, %v1638_v24 }
 0x53d   :  { %1913 = vpush %v906_v53 }
 0x53e   :  { %1915 = vpush %v913_v61  ;;  %1507 = vrot.lane.b32.xlu0 %v1499_v23, %s2012_s0  ;;  %v592_v25 = vpop.permute.xlu1 %591  ;;  %v1193_v26 = vpop.permute.xlu0 %1192  ;;  %s1890_s0 = spop %1889 }
 0x53f   :  { %v595_v27 = vsel %vm593_vm13, %v2386_v54, %v592_v25  ;;  %1647 = vrot.lane.b32.xlu1 %v1639_v22, %s2015_s15  ;;  %s2416_s2 = spop %1891  ;;  %v492_v45 = vstv %s1890_s0  ;;  %v1078_v22 = vsub.s32 4, %v2112_v13 }
 0x540   :  { %1767 = vmatprep.subr.msk.mxu0 %vm298_vm5, %v595_v27  ;;  %s2419_s8 = spop %1893  ;;  %v494_v51 = vmul.f32 %v492_v45, %v2429_v44 }
 0x541   :  { %s2421_s16 = spop %1895  ;;  %v504_v4 = vstv %s2419_s8 }
 0x542   :  { %1645 = vrot.lane.b32.xlu0 %v1642_v28, %s2015_s15  ;;  %v920_v31 = vpop.permute.xlu1 %919  ;;  %v1326_v32 = vpop.permute.xlu0 %1325  ;;  %v510_v12 = vstv %s2421_s16  ;;  %v1083_v28 = vrot.slane %v2127_v18, %v1078_v22 }
 0x543   :  { %1917 = vpush %v920_v31  ;;  %1734 = vperm.xlu1 %1980, %v1731_v30  }
 0x544   :  { %1919 = vpush %v927_v39  ;;  %v2459_v39 = vld [vmem:[%s2569_s4 + $0xc] sm:$0xf] }
 0x545   :  { %1921 = vpush %v2388_v55  ;;  %v498_v55 = vstv %s2416_s2  ;;  %v512_v19 = vmul.f32 %v510_v12, %v2459_v39 }
 0x546   :  { %1643 = vrot.lane.b32.xlu0 %v1638_v24, %s2015_s15  ;;  %v1055_v33 = vpop.permute.xlu1 %1054  ;;  %v1459_v35 = vpop.permute.xlu0 %1458  ;;  %s1898_s15 = spop %1897  ;;  %v500_v62 = vmul.f32 %v498_v55, %v2436_v49 }
 0x547   :  { %1923 = vpush %v1055_v33  ;;  %v539_v43 = vstv %s1898_s15 }
 0x548   :  { %1925 = vpush %v1062_v6  ;;  %v541_v47 = vmul.f32 %v539_v43, %v2429_v44 }
 0x54a   :  { %v1069_v34 = vpop.permute.xlu1 %1068  ;;  %v1466_v41 = vpop.permute.xlu0 %1465 }
 0x54b   :  { %1927 = vpush %v1069_v34 }
 0x54c   :  { %1929 = vpush %v2382_v48 }
 0x54d   :  { %1931 = vpush %v1179_v20 }
 0x54e   :  { %v588_v36 = vpop.permute.xlu1 %587  ;;  %v682_v50 = vpop.permute.xlu0 %681 }
 0x54f   :  { %v594_v40 = vsel %vm593_vm13, %v588_v36, %v2386_v54  ;;  %v2443_v54 = vld [vmem:[%s2570_s5] sm:$0xf] }
 0x550   :  { %1768 = vmatpush1.msk.msra.mxu0 %vm298_vm5, %v594_v40  ;;  %v542_v58 = vadd.f32 %v541_v47, %v2443_v54  ;;  %v495_v61 = vadd.f32 %v494_v51, %v2443_v54 }
 0x552   :  { %v1186_v42 = vpop.permute.xlu1 %1185  ;;  %v678_v63 = vpop.permute.xlu0 %677  ;;  %v501_v6 = vadd.f32 %v500_v62, %v495_v61 }
 0x553   :  { %1933 = vpush %v1186_v42 }
 0x554   :  { %1935 = vpush %v1193_v26  ;;  %s1900_s12 = spop %1899 }
 0x555   :  { %1937 = vpush %v2394_v7  ;;  %v546_v46 = vstv %s1900_s12  ;;  %v506_v7 = vmul.f32 %v504_v4, %v2449_v56 }
 0x556   :  { %v1319_v48 = vpop.permute.xlu1 %1318  ;;  %v548_v53 = vmul.f32 %v546_v46, %v2436_v49  ;;  %v1613_v14 = vpop.permute.xlu0 %1612 }
 0x557   :  { %1939 = vpush %v1319_v48  ;;  %v507_v16 = vadd.f32 %v506_v7, %v501_v6 }
 0x558   :  { %1941 = vpush %v1326_v32  ;;  %s1902_s19 = spop %1901  ;;  %v549_v38 = vadd.f32 %v548_v53, %v542_v58 }
 0x559   :  { %v553_v57 = vstv %s1902_s19  ;;  %v513_v23 = vadd.f32 %v512_v19, %v507_v16 }
 0x55a   :  { %v555_v59 = vmul.f32 %v553_v57, %v2449_v56  ;;  %v1333_v60 = vpop.permute.xlu1 %1332  ;;  %v821_v24 = vpop.permute.xlu0 %820 }
 0x55b   :  { %1943 = vpush %v1333_v60 }
 0x55c   :  { %1945 = vpush %v2384_v52  ;;  %s1904_s5 = spop %1903  ;;  %v556_v1 = vadd.f32 %v555_v59, %v549_v38 }
 0x55d   :  { %1947 = vpush %v1459_v35  ;;  %v560_v0 = vstv %s1904_s5  ;;  %s1906_s25 = spop %1905 }
 0x55e   :  { %1949 = vpush %v1466_v41  ;;  %v562_v2 = vmul.f32 %v560_v0, %v2459_v39  ;;  %v680_v3 = vpop.permute.xlu1 %679  ;;  %v766_v15 = vstv %s1906_s25  ;;  %s1908_s4 = spop %1907  ;;  %v961_v34 = vpop.permute.xlu0 %960  ;;  %s1986_s25 = scalar_lea.vmem %s1751_s24, 128 }
 0x55f   :  { %v684_v5 = vsel %vm40_vm4, %v680_v3, %v682_v50  ;;  %v683_v9 = vsel %vm40_vm4, %v678_v63, %v680_v3  ;;  %v768_v20 = vmul.f32 %v766_v15, %v2429_v44  ;;  %v773_v25 = vstv %s1908_s4  ;;  %p1987_p0 = scmp.ne.s32.totalorder %s1751_s24, %s1986_s25  ;;  %p1992_p2 = scmp.lt.s32.totalorder %s1986_s25, %s1986_s25 }
 0x560   :  { %v563_v52 = vadd.f32 %v562_v2, %v556_v1  ;;  %1770 = vmatprep.subr.msk.mxu0 %vm298_vm5, %v684_v5  ;;  %v775_v29 = vmul.f32 %v773_v25, %v2436_v49 }
 0x561   :  { %v769_v26 = vadd.f32 %v768_v20, %v2443_v54  ;;  %p1993_p3 = por %p1992_p2, %p1991_p1 }
 0x562   :  { %v1473_v10 = vpop.permute.xlu1 %1472  ;;  %1769 = vmatmul.mubr.msk.f32.vlgmr.msra.gmra.mrb[2].mxu0 %vm294_vm7, %v563_v52  ;;  %v959_v51 = vpop.permute.xlu0 %958 }
 0x563   :  { %1771 = vmatpush1.msk.msra.mxu0 %vm298_vm5, %v683_v9  ;;  %1951 = vpush %v1473_v10  ;;  %756 = vmatprep.mubr.f32.mxu0 %v2011_v8  ;;  %v776_v30 = vadd.f32 %v775_v29, %v769_v26  ;;  %v965_v62 = vsel %vm964_vm12, %v959_v51, %v961_v34  ;;  %p1994_p4 = pnand %p1993_p3, %p1987_p0 }
 0x564   :  { %1953 = vpush %v2397_v11  ;;  %v1079_v11 = vrot.slane %v2122_v17, %v1078_v22 }
 0x566   :  { %v1599_v21 = vpop.permute.xlu1 %1598  ;;  %v1086_v17 = vcombine.low %v1079_v11, %v1083_v28  ;;  %v1228_v6 = vpop.permute.xlu0 %1227 }
 0x567   :  { %1955 = vpush %v1599_v21 }
 0x568   :  { %v1088_v48 = vmul.f32 %v1086_v17, %v2156_v37 }
 0x56a   :  { %v1606_v27 = vpop.permute.xlu1 %1605  ;;  %1772 = vmatmul.mubr.msk.f32.vlgmr.msra.gmra.mrb[2].mxu0 %vm294_vm7, %v513_v23  ;;  %v1090_v61 = vcombine.high %v1088_v48, %v1088_v48 }
 0x56b   :  { %1957 = vpush %v1606_v27  ;;  %896 = vmatprep.mubr.f32.mxu0 %v2011_v8 }
 0x56c   :  { %1959 = vpush %v1613_v14  ;;  %s1910_s26 = spop %1909 }
 0x56d   :  { %v780_v13 = vstv %s1910_s26  ;;  %s1912_s27 = spop %1911 }
 0x56e   :  { %v782_v31 = vmul.f32 %v780_v13, %v2449_v56  ;;  %v787_v32 = vstv %s1912_s27  ;;  %s1914_s28 = spop %1913  ;;  %v819_v33 = vpop.permute.xlu1 %818 }
 0x56f   :  { %v908_v35 = vstv %s1914_s28  ;;  %s1916_s29 = spop %1915  ;;  %v824_v36 = vsel %vm822_vm14, %v819_v33, %v821_v24  ;;  %v789_v18 = vmul.f32 %v787_v32, %v2459_v39 }
 0x570   :  { %v783_v40 = vadd.f32 %v782_v31, %v776_v30  ;;  %v910_v41 = vmul.f32 %v908_v35, %v2429_v44  ;;  %1773 = vmatprep.subr.msk.mxu0 %vm298_vm5, %v824_v36  ;;  %v915_v42 = vstv %s1916_s29 }
 0x571   :  { %v917_v50 = vmul.f32 %v915_v42, %v2436_v49 }
 0x572   :  { %v790_v43 = vadd.f32 %v789_v18, %v783_v40  ;;  %v911_v45 = vadd.f32 %v910_v41, %v2443_v54  ;;  %v817_v46 = vpop.permute.xlu1 %816 }
 0x573   :  { %v823_v47 = vsel %vm822_vm14, %v817_v46, %v819_v33 }
 0x574   :  { %1774 = vmatpush1.msk.msra.mxu0 %vm298_vm5, %v823_v47  ;;  %s1918_s30 = spop %1917  ;;  %v918_v55 = vadd.f32 %v917_v50, %v911_v45 }
 0x575   :  { %v922_v53 = vstv %s1918_s30  ;;  %s1920_s1 = spop %1919  ;;  %1775 = vmatmul.mubr.msk.f32.vlgmr.msra.gmra.mrb[2].mxu0 %vm294_vm7, %v790_v43 }
 0x576   :  { %v924_v57 = vmul.f32 %v922_v53, %v2449_v56  ;;  %v929_v58 = vstv %s1920_s1  ;;  %s1922_s10 = spop %1921  ;;  %v963_v59 = vpop.permute.xlu1 %962  ;;  %1038 = vmatprep.mubr.f32.mxu0 %v2011_v8 }
 0x577   :  { %v1050_v60 = vstv %s1922_s10  ;;  %v966_v37 = vsel %vm964_vm12, %v961_v34, %v963_v59  ;;  %v931_v63 = vmul.f32 %v929_v58, %v2459_v39 }
 0x578   :  { %v925_v38 = vadd.f32 %v924_v57, %v918_v55  ;;  %v1052_v0 = vmul.f32 %v1050_v60, %v2429_v44  ;;  %1776 = vmatprep.subr.msk.mxu0 %vm298_vm5, %v966_v37  ;;  %s1924_s11 = spop %1923 }
 0x579   :  { %v1057_v1 = vstv %s1924_s11  ;;  %s1926_s7 = spop %1925  ;;  %1777 = vmatpush1.msk.msra.mxu0 %vm298_vm5, %v965_v62 }
 0x57a   :  { %v932_v2 = vadd.f32 %v931_v63, %v925_v38  ;;  %v1053_v3 = vadd.f32 %v1052_v0, %v2443_v54  ;;  %v1059_v4 = vmul.f32 %v1057_v1, %v2436_v49  ;;  %v1064_v5 = vstv %s1926_s7  ;;  %1779 = vmatprep.subr.msk.mxu0 %vm298_vm5, %v1090_v61  ;;  %v1226_v52 = vpop.permute.xlu1 %1225 }
 0x57b   :  { %v1066_v9 = vmul.f32 %v1064_v5, %v2449_v56  ;;  %v1230_v12 = vsel %vm949_vm10, %v1226_v52, %v1228_v6 }
 0x57c   :  { %v1060_v7 = vadd.f32 %v1059_v4, %v1053_v3  ;;  %s1928_s14 = spop %1927 }
 0x57d   :  { %v1071_v10 = vstv %s1928_s14  ;;  %s1930_s0 = spop %1929  ;;  %1778 = vmatmul.mubr.msk.f32.vlgmr.msra.gmra.mrb[2].mxu0 %vm294_vm7, %v932_v2 }
 0x57e   :  { %v1174_v14 = vstv %s1930_s0  ;;  %s1932_s2 = spop %1931  ;;  %1780 = vmatpush1.msk.msra.mxu0 %vm298_vm5, %v1088_v48  ;;  %1162 = vmatprep.mubr.f32.mxu0 %v2011_v8  ;;  %v1067_v15 = vadd.f32 %v1066_v9, %v1060_v7  ;;  %v1073_v16 = vmul.f32 %v1071_v10, %v2459_v39  ;;  %v1224_v22 = vpop.permute.xlu1 %1223 }
 0x57f   :  { %v1176_v19 = vmul.f32 %v1174_v14, %v2429_v44  ;;  %1782 = vmatprep.subr.msk.mxu0 %vm298_vm5, %v1230_v12  ;;  %v1181_v20 = vstv %s1932_s2  ;;  %v1229_v25 = vsel %vm949_vm10, %v1224_v22, %v1226_v52 }
 0x580   :  { %v1074_v23 = vadd.f32 %v1073_v16, %v1067_v15  ;;  %v1183_v24 = vmul.f32 %v1181_v20, %v2436_v49 }
 0x581   :  { %v1177_v21 = vadd.f32 %v1176_v19, %v2443_v54 }
 0x583   :  { %v1184_v27 = vadd.f32 %v1183_v24, %v1177_v21 }
 0x584   :  { %s1934_s8 = spop %1933 }
 0x585   :  { %v1188_v26 = vstv %s1934_s8  ;;  %s1936_s16 = spop %1935  ;;  %1781 = vmatmul.mubr.msk.f32.vlgmr.msra.gmra.mrb[2].mxu0 %vm294_vm7, %v1074_v23 }
 0x586   :  { %v1190_v11 = vmul.f32 %v1188_v26, %v2449_v56  ;;  %v1195_v28 = vstv %s1936_s16  ;;  %1783 = vmatpush1.msk.msra.mxu0 %vm298_vm5, %v1229_v25  ;;  %1302 = vmatprep.mubr.f32.mxu0 %v2011_v8  ;;  %s1938_s15 = spop %1937 }
 0x587   :  { %v1197_v13 = vmul.f32 %v1195_v28, %v2459_v39  ;;  %v1314_v31 = vstv %s1938_s15 }
 0x588   :  { %v1191_v29 = vadd.f32 %v1190_v11, %v1184_v27  ;;  %s1940_s12 = spop %1939  ;;  %v1316_v33 = vmul.f32 %v1314_v31, %v2429_v44 }
 0x589   :  { %v1321_v32 = vstv %s1940_s12  ;;  %s1942_s13 = spop %1941 }
 0x58a   :  { %v1198_v30 = vadd.f32 %v1197_v13, %v1191_v29  ;;  %v1323_v34 = vmul.f32 %v1321_v32, %v2436_v49  ;;  %v1317_v35 = vadd.f32 %v1316_v33, %v2443_v54  ;;  %v1328_v36 = vstv %s1942_s13 }
 0x58b   :  { %v1330_v42 = vmul.f32 %v1328_v36, %v2449_v56 }
 0x58c   :  { %s1944_s3 = spop %1943  ;;  %v1324_v40 = vadd.f32 %v1323_v34, %v1317_v35 }
 0x58d   :  { %1784 = vmatmul.mubr.msk.f32.vlgmr.msra.gmra.mrb[2].mxu0 %vm294_vm7, %v1198_v30  ;;  %s1946_s17 = spop %1945  ;;  %v1335_v41 = vstv %s1944_s3 }
 0x58e   :  { %1442 = vmatprep.mubr.f32.mxu0 %v2011_v8  ;;  %v1454_v17 = vstv %s1946_s17  ;;  %s1948_s18 = spop %1947  ;;  %v1331_v46 = vadd.f32 %v1330_v42, %v1324_v40  ;;  %v1337_v47 = vmul.f32 %v1335_v41, %v2459_v39 }
 0x58f   :  { %v1456_v43 = vmul.f32 %v1454_v17, %v2429_v44  ;;  %s1950_s19 = spop %1949  ;;  %v1461_v51 = vstv %s1948_s18 }
 0x590   :  { %v1338_v57 = vadd.f32 %v1337_v47, %v1331_v46  ;;  %v1463_v58 = vmul.f32 %v1461_v51, %v2436_v49  ;;  %v1468_v60 = vstv %s1950_s19 }
 0x591   :  { %v1457_v53 = vadd.f32 %v1456_v43, %v2443_v54  ;;  %v1470_v1 = vmul.f32 %v1468_v60, %v2449_v56 }
 0x593   :  { %v1464_v38 = vadd.f32 %v1463_v58, %v1457_v53 }
 0x594   :  { %s1952_s20 = spop %1951 }
 0x595   :  { %s1954_s6 = spop %1953  ;;  %v1475_v37 = vstv %s1952_s20  ;;  %v1471_v7 = vadd.f32 %v1470_v1, %v1464_v38 }
 0x596   :  { %v1594_v61 = vstv %s1954_s6  ;;  %v1477_v2 = vmul.f32 %v1475_v37, %v2459_v39 }
 0x597   :  { %v1596_v3 = vmul.f32 %v1594_v61, %v2429_v44 }
 0x598   :  { %s1956_s21 = spop %1955  ;;  %v1478_v12 = vadd.f32 %v1477_v2, %v1471_v7 }
 0x599   :  { %v1601_v63 = vstv %s1956_s21  ;;  %v1597_v14 = vadd.f32 %v1596_v3, %v2443_v54 }
 0x59a   :  { %v1603_v9 = vmul.f32 %v1601_v63, %v2436_v49 }
 0x59c   :  { %s1958_s22 = spop %1957  ;;  %v1604_v16 = vadd.f32 %v1603_v9, %v1597_v14 }
 0x59d   :  { %v1608_v5 = vstv %s1958_s22  ;;  %s1960_s5 = spop %1959 }
 0x59e   :  { %v1610_v15 = vmul.f32 %v1608_v5, %v2449_v56  ;;  %v1615_v19 = vstv %s1960_s5 }
 0x59f   :  { %v1617_v54 = vmul.f32 %v1615_v19, %v2459_v39 }
 0x5a0   :  { %v1611_v49 = vadd.f32 %v1610_v15, %v1604_v16 }
 0x5a2   :  { %v1618_v56 = vadd.f32 %v1617_v54, %v1611_v49 }
 0x5a5   :  { %v1368_v18 = vpop.permute.xlu1 %1367 }
 0x5a8   :  { %v1366_v45 = vpop.permute.xlu0 %1365 }
 0x5a9   :  { %v1370_v48 = vsel %vm807_vm11, %v1366_v45, %v1368_v18  ;;  %v1506_v50 = vpop.permute.xlu1 %1505 }
 0x5aa   :  { %1785 = vmatprep.subr.msk.mxu0 %vm298_vm5, %v1370_v48 }
 0x5ac   :  { %v1364_v55 = vpop.permute.xlu0 %1363 }
 0x5ad   :  { %v1369_v59 = vsel %vm807_vm11, %v1364_v55, %v1366_v45  ;;  %v1504_v62 = vpop.permute.xlu1 %1503 }
 0x5ae   :  { %1786 = vmatpush1.msk.msra.mxu0 %vm298_vm5, %v1369_v59  ;;  %v1509_v6 = vsel %vm578_vm8, %v1504_v62, %v1506_v50 }
 0x5af   :  { %1787 = vmatmul.mubr.msk.f32.vlgmr.msra.gmra.mrb[2].mxu0 %vm294_vm7, %v1338_v57 }
 0x5b0   :  { %v1508_v0 = vpop.permute.xlu0 %1507  ;;  %1582 = vmatprep.mubr.f32.mxu0 %v2011_v8 }
 0x5b1   :  { %v1510_v4 = vsel %vm578_vm8, %v1506_v50, %v1508_v0  ;;  %v1648_v52 = vpop.permute.xlu1 %1647 }
 0x5b2   :  { %1788 = vmatprep.subr.msk.mxu0 %vm298_vm5, %v1510_v4 }
 0x5b3   :  { %1789 = vmatpush1.msk.msra.mxu0 %vm298_vm5, %v1509_v6 }
 0x5b4   :  { %v1646_v10 = vpop.permute.xlu0 %1645 }
 0x5b5   :  { %v1650_v44 = vsel %vm530_vm9, %v1646_v10, %v1648_v52 }
 0x5b6   :  { %1793 = vmatprep.subr.msk.mxu0 %vm298_vm5, %v1650_v44 }
 0x5b7   :  { %1790 = vmatmul.mubr.msk.f32.vlgmr.msra.gmra.mrb[2].mxu0 %vm294_vm7, %v1478_v12 }
 0x5b8   :  { %v1644_v20 = vpop.permute.xlu0 %1643  ;;  %1722 = vmatprep.mubr.f32.mxu0 %v2011_v8 }
 0x5b9   :  { %v1649_v21 = vsel %vm530_vm9, %v1644_v20, %v1646_v10 }
 0x5ba   :  { %1794 = vmatpush1.msk.msra.mxu0 %vm298_vm5, %v1649_v21 }
 0x5bf   :  { %1795 = vmatmul.mubr.msk.f32.vlgmr.msra.gmra.mrb[2].mxu0 %vm294_vm7, %v1618_v56 }
 0x5c2   :  { %v1735_v22 = vpop.permute.xlu1 %1734 }
 0x692   :  { %v1724_v23 = vpop.f32.mrb[2].mxu0 }
 0x693   :  { %v1737_v24 = vadd.f32 %v1735_v22, %v1724_v23  ;;  %v1726_v25 = vpop.f32.mrb[3].mxu0 }
 0x694   :  { %v1738_v26 = vadd.f32 %v1735_v22, %v1726_v25 }
 0x696   :  { %v1741_v27 = vcombine.low %v1737_v24, %v1738_v26 }
 0x698   :  { %1743 = vst [vmem:[#allocation3] sm:$0xff] %v1741_v27 }
 0x699   :  { %1997 = shalt.err (!%p1994_p4)
}
 0x69a   :  { %s1998_s27 = scalar_lea.hbm %s2574_s9, 128 }
 0x69b   :  { %p1999_p5 = scmp.ne.s32.totalorder %s2574_s9, %s1998_s27  ;;  %p2002_p6 = scmp.lt.u32.totalorder %s1998_s27, %s2574_s9 }
 0x69d   :  { %p2004_p7 = pnand %p2002_p6, %p1999_p5 }
 0x69f   :  { %2007 = shalt.err (!%p2004_p7)
}
 0x6a0   :  { %1753 = dma.vmem_to_hbm [thread:$0]  %s1751_s24, 128, %s2574_s9, [#allocation4]  }
 0x6a1   :  { %2008 = dma.done.wait [#allocation4], 128  }
 0x6a2   :  { %2009 = vsyncadd [#allocation4], 4294967168 }
 0x6a3   :  { %1757 = vsyncpa [#allocation4], 1 }

</bundles_post_ra>
